<compile_context>
chip_gen: v6e
topology: v6e:2x2x1
jax: 0.10.0
libtpu: 0.0.40
codegen_flags: <defaults>
</compile_context>

<pallas_src>
import math

import jax
import jax.numpy as jnp
from jax.experimental import pallas as pl
from jax.experimental.pallas import tpu as pltpu

# ------------------------- BabyJoeyConfig analogue -------------------------
VOCAB_SIZE = 64
N_EMBD = 32
N_HEAD = 4
N_LAYER = 2
MAX_POS = 16
BATCH = 2
SEQ = 8
LN_EPS = 1e-5


# ------------------------------ kernel helpers ------------------------------
def _layernorm(x, w, b):
    """LayerNorm over last dim (biased variance, eps=1e-5), like torch."""
    mean = jnp.mean(x, axis=-1, keepdims=True)
    var = jnp.mean((x - mean) ** 2, axis=-1, keepdims=True)
    return (x - mean) * jax.lax.rsqrt(var + LN_EPS) * w + b


def _matmul_wT(x, w):
    """x @ w.T without an explicit transpose (contract last dims)."""
    return jax.lax.dot_general(
        x, w, (((1,), (1,)), ((), ())), preferred_element_type=jnp.float32)


# ------------------------------ fused kernel --------------------------------
def _babyjoey_kernel(ids_ref, tok_ref, pos_ref, hmask_ref,
                     wq_ref, bq_ref, wk_ref, bk_ref, wv_ref, bv_ref,
                     wo_ref, bo_ref, ln1w_ref, ln1b_ref,
                     fc1w_ref, fc1b_ref, fc2w_ref, fc2b_ref,
                     ln2w_ref, ln2b_ref, lnfw_ref, lnfb_ref, headw_ref,
                     o_ref):
    # Row n of the flattened activation corresponds to (b = n // T, t = n % T).
    N = ids_ref.shape[0]                  # B * T
    V, E = tok_ref.shape
    P = pos_ref.shape[0]
    B, T, _ = o_ref.shape
    n_layer = wq_ref.shape[0]

    # ---- embeddings: token + position via one-hot matmuls (gather-free) ----
    ids = ids_ref[...]
    tok_oh = (ids == jax.lax.broadcasted_iota(jnp.int32, (N, V), 1)
              ).astype(jnp.float32)
    x = jnp.dot(tok_oh, tok_ref[...], preferred_element_type=jnp.float32)
    pos_idx = jax.lax.broadcasted_iota(jnp.int32, (N, 1), 0) % T
    pos_oh = (pos_idx == jax.lax.broadcasted_iota(jnp.int32, (N, P), 1)
              ).astype(jnp.float32)
    x = x + jnp.dot(pos_oh, pos_ref[...], preferred_element_type=jnp.float32)

    # Block-diagonal (E, E) ones mask: (q*k) @ hmask produces, for every lane d,
    # the dot-product of head(d) -- i.e. a per-head reduce already broadcast
    # back across that head's Dh lanes.  Keeps attention out of tiny MXU shapes.
    hmask = hmask_ref[...]

    for l in range(n_layer):
        # ---- multi-head self-attention (attends across the original batch
        #      axis, length B, batched over (t, head) -- torch seq-first MHA
        #      semantics on a (B, T, E) input). 1/sqrt(Dh) folded into wq/bq. ----
        q = _matmul_wT(x, wq_ref[l]) + bq_ref[l]          # (N, E)
        k = _matmul_wT(x, wk_ref[l]) + bk_ref[l]
        v = _matmul_wT(x, wv_ref[l]) + bv_ref[l]

        scores = []
        for c in range(B):
            kc = k[c * T:(c + 1) * T, :]                  # (T, E), aligned slice
            kc_full = jnp.concatenate([kc] * B, axis=0)   # (N, E): key of (c, t)
            scores.append(jnp.dot(q * kc_full, hmask,
                                  preferred_element_type=jnp.float32))
        m = scores[0]
        for s in scores[1:]:
            m = jnp.maximum(m, s)
        es = [jnp.exp(s - m) for s in scores]
        denom = es[0]
        for e in es[1:]:
            denom = denom + e
        inv = 1.0 / denom

        attn = jnp.zeros((N, E), jnp.float32)
        for c in range(B):
            vc = v[c * T:(c + 1) * T, :]
            vc_full = jnp.concatenate([vc] * B, axis=0)
            attn = attn + (es[c] * inv) * vc_full         # PV on the VPU
        attn = _matmul_wT(attn, wo_ref[l]) + bo_ref[l]    # single out_proj matmul

        # ---- residual + ln1 ----
        x1 = _layernorm(x + attn, ln1w_ref[l], ln1b_ref[l])

        # ---- MLP: Linear(E,4E) -> ReLU -> Linear(4E,E) ----
        h1 = jnp.maximum(_matmul_wT(x1, fc1w_ref[l]) + fc1b_ref[l], 0.0)
        mo = _matmul_wT(h1, fc2w_ref[l]) + fc2b_ref[l]

        # ---- residual + ln2 ----
        x = _layernorm(x1 + mo, ln2w_ref[l], ln2b_ref[l])

    # ---- final LayerNorm + vocab head ----
    xn = _layernorm(x, lnfw_ref[...], lnfb_ref[...])
    logits = _matmul_wT(xn, headw_ref[...])               # (N, V)
    o_ref[...] = logits.reshape(B, T, V)                  # leading-dim split only


# ------------------------------ pallas wrapper -------------------------------
def _vmem_specs(n):
    return [pl.BlockSpec(memory_space=pltpu.MemorySpace.VMEM) for _ in range(n)]


def prepare_params(params):
    """One-time host-side repack: split in_proj into q/k/v, fold the 1/sqrt(Dh)
    scale into the q weights, stack per-layer weights along a leading layer
    axis, and build the block-diagonal per-head reduction mask."""
    E, H = N_EMBD, N_HEAD
    Dh = E // H
    scale = 1.0 / math.sqrt(Dh)

    def stack(fn):
        return jnp.stack([fn(b) for b in params['blocks']], axis=0)

    lane_head = jnp.arange(E) // Dh
    head_mask = (lane_head[:, None] == lane_head[None, :]).astype(jnp.float32)

    return {
        'tok_emb': params['tok_emb'],
        'pos_emb': params['pos_emb'],
        'head_mask': head_mask,
        'wq': stack(lambda b: b['in_proj_w'][:E] * scale),
        'bq': stack(lambda b: b['in_proj_b'][:, :E] * scale),
        'wk': stack(lambda b: b['in_proj_w'][E:2 * E]),
        'bk': stack(lambda b: b['in_proj_b'][:, E:2 * E]),
        'wv': stack(lambda b: b['in_proj_w'][2 * E:]),
        'bv': stack(lambda b: b['in_proj_b'][:, 2 * E:]),
        'wo': stack(lambda b: b['out_proj_w']),
        'bo': stack(lambda b: b['out_proj_b']),
        'ln1_w': stack(lambda b: b['ln1_w']),
        'ln1_b': stack(lambda b: b['ln1_b']),
        'fc1_w': stack(lambda b: b['fc1_w']),
        'fc1_b': stack(lambda b: b['fc1_b']),
        'fc2_w': stack(lambda b: b['fc2_w']),
        'fc2_b': stack(lambda b: b['fc2_b']),
        'ln2_w': stack(lambda b: b['ln2_w']),
        'ln2_b': stack(lambda b: b['ln2_b']),
        'lnf_w': params['lnf_w'],
        'lnf_b': params['lnf_b'],
        'head_w': params['head_w'],
    }


def baby_joey_forward(token_ids, kp):
    """Single fused pallas_call: (B, T) int32 token ids -> (B, T, V) logits."""
    B, T = token_ids.shape
    ids2 = token_ids.reshape(B * T, 1).astype(jnp.int32)   # free metadata reshape
    args = (ids2, kp['tok_emb'], kp['pos_emb'], kp['head_mask'],
            kp['wq'], kp['bq'], kp['wk'], kp['bk'], kp['wv'], kp['bv'],
            kp['wo'], kp['bo'], kp['ln1_w'], kp['ln1_b'],
            kp['fc1_w'], kp['fc1_b'], kp['fc2_w'], kp['fc2_b'],
            kp['ln2_w'], kp['ln2_b'], kp['lnf_w'], kp['lnf_b'], kp['head_w'])
    return pl.pallas_call(
        _babyjoey_kernel,
        out_shape=jax.ShapeDtypeStruct((B, T, VOCAB_SIZE), jnp.float32),
        in_specs=_vmem_specs(len(args)),
        out_specs=pl.BlockSpec(memory_space=pltpu.MemorySpace.VMEM),
    )(*args)


# --------------------------- deterministic params ----------------------------
def init_params(key):
    keys = iter(jax.random.split(key, 8 + 8 * N_LAYER))

    def nrm(shape, scale=0.02):
        return scale * jax.random.normal(next(keys), shape, dtype=jnp.float32)

    E, V, P, F = N_EMBD, VOCAB_SIZE, MAX_POS, 4 * N_EMBD
    params = {
        'tok_emb': nrm((V, E)),
        'pos_emb': nrm((P, E)),
        'lnf_w': jnp.ones((1, E), jnp.float32),
        'lnf_b': jnp.zeros((1, E), jnp.float32),
        'head_w': nrm((V, E)),
        'blocks': [],
    }
    for _ in range(N_LAYER):
        params['blocks'].append({
            'in_proj_w': nrm((3 * E, E)),
            'in_proj_b': nrm((1, 3 * E)),
            'out_proj_w': nrm((E, E)),
            'out_proj_b': nrm((1, E)),
            'ln1_w': jnp.ones((1, E), jnp.float32),
            'ln1_b': jnp.zeros((1, E), jnp.float32),
            'fc1_w': nrm((F, E)),
            'fc1_b': nrm((1, F)),
            'fc2_w': nrm((E, F)),
            'fc2_b': nrm((1, E)),
            'ln2_w': jnp.ones((1, E), jnp.float32),
            'ln2_b': jnp.zeros((1, E), jnp.float32),
        })
    return params


# ----------------------------- pure-JAX reference ----------------------------
def _ref_ln(x, w, b):
    mean = jnp.mean(x, axis=-1, keepdims=True)
    var = jnp.mean((x - mean) ** 2, axis=-1, keepdims=True)
    return (x - mean) / jnp.sqrt(var + LN_EPS) * w + b


def reference_forward(token_ids, params):
    B, T = token_ids.shape
    E, H = N_EMBD, N_HEAD
    Dh = E // H
    x = params['tok_emb'][token_ids] + params['pos_emb'][jnp.arange(T)][None]
    x = jnp.transpose(x, (1, 0, 2))                               # (T, B, E)
    for p in params['blocks']:
        xf = x.reshape(T * B, E)
        qkv = xf @ p['in_proj_w'].T + p['in_proj_b'][0]
        q, k, v = jnp.split(qkv, 3, axis=-1)
        q = q.reshape(T, B, H, Dh)
        k = k.reshape(T, B, H, Dh)
        v = v.reshape(T, B, H, Dh)
        s = jnp.einsum('sbhd,schd->shbc', q, k) / math.sqrt(Dh)
        pr = jax.nn.softmax(s, axis=-1)
        o = jnp.einsum('shbc,schd->sbhd', pr, v).reshape(T * B, E)
        attn = o @ p['out_proj_w'].T + p['out_proj_b'][0]
        x1 = _ref_ln(xf + attn, p['ln1_w'][0], p['ln1_b'][0])
        h1 = jax.nn.relu(x1 @ p['fc1_w'].T + p['fc1_b'][0])
        m = h1 @ p['fc2_w'].T + p['fc2_b'][0]
        x = _ref_ln(x1 + m, p['ln2_w'][0], p['ln2_b'][0]).reshape(T, B, E)
    x = jnp.transpose(x, (1, 0, 2)).reshape(B * T, E)
    x = _ref_ln(x, params['lnf_w'][0], params['lnf_b'][0])
    return (x @ params['head_w'].T).reshape(B, T, VOCAB_SIZE)


# ------------------------------------ main -----------------------------------
if __name__ == "__main__":
    key = jax.random.PRNGKey(0)
    pkey, dkey = jax.random.split(key)
    params = init_params(pkey)
    kparams = prepare_params(params)      # one-time repack for the fused kernel
    token_ids = jax.random.randint(dkey, (BATCH, SEQ), 0, VOCAB_SIZE,
                                   dtype=jnp.int32)

    logits = baby_joey_forward(token_ids, kparams)
    logits = jax.block_until_ready(logits)

    assert logits.shape == (BATCH, SEQ, VOCAB_SIZE)
    assert bool(jnp.all(jnp.isfinite(logits)))

    ref = reference_forward(token_ids, params)
    assert bool(jnp.allclose(logits, ref, atol=1e-3, rtol=1e-3)), \
        float(jnp.max(jnp.abs(logits - ref)))

    print("KERNEL_OK")
</pallas_src>

<mosaic_0001>
module attributes {stable_mosaic.version = 11 : i64} {
  func.func @_babyjoey_kernel(%arg0: memref<16x1xi32, #tpu.memory_space<vmem>>, %arg1: memref<64x32xf32, #tpu.memory_space<vmem>>, %arg2: memref<16x32xf32, #tpu.memory_space<vmem>>, %arg3: memref<32x32xf32, #tpu.memory_space<vmem>>, %arg4: memref<2x32x32xf32, #tpu.memory_space<vmem>>, %arg5: memref<2x1x32xf32, #tpu.memory_space<vmem>>, %arg6: memref<2x32x32xf32, #tpu.memory_space<vmem>>, %arg7: memref<2x1x32xf32, #tpu.memory_space<vmem>>, %arg8: memref<2x32x32xf32, #tpu.memory_space<vmem>>, %arg9: memref<2x1x32xf32, #tpu.memory_space<vmem>>, %arg10: memref<2x32x32xf32, #tpu.memory_space<vmem>>, %arg11: memref<2x1x32xf32, #tpu.memory_space<vmem>>, %arg12: memref<2x1x32xf32, #tpu.memory_space<vmem>>, %arg13: memref<2x1x32xf32, #tpu.memory_space<vmem>>, %arg14: memref<2x128x32xf32, #tpu.memory_space<vmem>>, %arg15: memref<2x1x128xf32, #tpu.memory_space<vmem>>, %arg16: memref<2x32x128xf32, #tpu.memory_space<vmem>>, %arg17: memref<2x1x32xf32, #tpu.memory_space<vmem>>, %arg18: memref<2x1x32xf32, #tpu.memory_space<vmem>>, %arg19: memref<2x1x32xf32, #tpu.memory_space<vmem>>, %arg20: memref<1x32xf32, #tpu.memory_space<vmem>>, %arg21: memref<1x32xf32, #tpu.memory_space<vmem>>, %arg22: memref<64x32xf32, #tpu.memory_space<vmem>>, %arg23: memref<2x8x64xf32, #tpu.memory_space<vmem>>) attributes {dimension_semantics = [], scalar_prefetch = 0 : i64, scratch_operands = 0 : i64, tpu.core_type = #tpu.core_type<tc>} {
    %c0 = arith.constant 0 : index
    %c0_0 = arith.constant 0 : index
    %0 = vector.load %arg0[%c0, %c0_0] : memref<16x1xi32, #tpu.memory_space<vmem>>, vector<16x1xi32>
    %1 = tpu.iota {dimensions = array<i32: 1>} : vector<16x64xi32>
    %2 = vector.broadcast %0 : vector<16x1xi32> to vector<16x64xi32>
    %3 = arith.cmpi eq, %2, %1 : vector<16x64xi32>
    %4 = arith.extui %3 : vector<16x64xi1> to vector<16x64xi32>
    %5 = arith.sitofp %4 : vector<16x64xi32> to vector<16x64xf32>
    %c0_1 = arith.constant 0 : index
    %c0_2 = arith.constant 0 : index
    %6 = vector.load %arg1[%c0_1, %c0_2] : memref<64x32xf32, #tpu.memory_space<vmem>>, vector<64x32xf32>
    %cst = arith.constant dense<0.000000e+00> : vector<16x32xf32>
    %7 = tpu.matmul %5, %6, %cst {dimension_numbers = #tpu.dot_dimension_numbers<[1], [0], [0], [1], [0, 0, 1, 1], [], []>} : vector<16x64xf32>, vector<64x32xf32>, vector<16x32xf32> -> vector<16x32xf32>
    %8 = tpu.iota {dimensions = array<i32: 0>} : vector<16x1xi32>
    %c8_i32 = arith.constant 8 : i32
    %c0_i32 = arith.constant 0 : i32
    %9 = arith.cmpi eq, %c8_i32, %c0_i32 : i32
    %c1_i32 = arith.constant 1 : i32
    %10 = arith.select %9, %c1_i32, %c8_i32 : i32
    %11 = vector.broadcast %10 : i32 to vector<16x1xi32>
    %12 = arith.remsi %8, %11 : vector<16x1xi32>
    %c0_i32_3 = arith.constant 0 : i32
    %13 = vector.broadcast %c0_i32_3 : i32 to vector<16x1xi32>
    %14 = arith.cmpi ne, %12, %13 : vector<16x1xi32>
    %c0_i32_4 = arith.constant 0 : i32
    %15 = vector.broadcast %c0_i32_4 : i32 to vector<16x1xi32>
    %16 = arith.cmpi slt, %12, %15 : vector<16x1xi32>
    %c0_i32_5 = arith.constant 0 : i32
    %17 = arith.cmpi slt, %10, %c0_i32_5 : i32
    %18 = vector.broadcast %17 : i1 to vector<16x1xi1>
    %19 = vector.broadcast %18 : vector<16x1xi1> to vector<16x1xi1>
    %20 = arith.xori %16, %19 : vector<16x1xi1>
    %21 = arith.andi %20, %14 : vector<16x1xi1>
    %22 = vector.broadcast %10 : i32 to vector<16x1xi32>
    %23 = arith.addi %12, %22 : vector<16x1xi32>
    %24 = arith.select %21, %23, %12 : vector<16x1xi1>, vector<16x1xi32>
    %25 = tpu.iota {dimensions = array<i32: 1>} : vector<16x16xi32>
    %26 = vector.broadcast %24 : vector<16x1xi32> to vector<16x16xi32>
    %27 = arith.cmpi eq, %26, %25 : vector<16x16xi32>
    %28 = arith.extui %27 : vector<16x16xi1> to vector<16x16xi32>
    %29 = arith.sitofp %28 : vector<16x16xi32> to vector<16x16xf32>
    %c0_6 = arith.constant 0 : index
    %c0_7 = arith.constant 0 : index
    %30 = vector.load %arg2[%c0_6, %c0_7] : memref<16x32xf32, #tpu.memory_space<vmem>>, vector<16x32xf32>
    %cst_8 = arith.constant dense<0.000000e+00> : vector<16x32xf32>
    %31 = tpu.matmul %29, %30, %cst_8 {dimension_numbers = #tpu.dot_dimension_numbers<[1], [0], [0], [1], [0, 0, 1, 1], [], []>} : vector<16x16xf32>, vector<16x32xf32>, vector<16x32xf32> -> vector<16x32xf32>
    %32 = arith.addf %7, %31 : vector<16x32xf32>
    %c0_9 = arith.constant 0 : index
    %c0_10 = arith.constant 0 : index
    %33 = vector.load %arg3[%c0_9, %c0_10] : memref<32x32xf32, #tpu.memory_space<vmem>>, vector<32x32xf32>
    %c0_11 = arith.constant 0 : index
    %c0_12 = arith.constant 0 : index
    %c0_13 = arith.constant 0 : index
    %34 = vector.load %arg4[%c0_11, %c0_12, %c0_13] : memref<2x32x32xf32, #tpu.memory_space<vmem>>, vector<1x32x32xf32>
    %35 = vector.shape_cast %34 : vector<1x32x32xf32> to vector<32x32xf32>
    %cst_14 = arith.constant dense<0.000000e+00> : vector<16x32xf32>
    %36 = tpu.matmul %32, %35, %cst_14 {dimension_numbers = #tpu.dot_dimension_numbers<[1], [1], [0], [0], [0, 0, 1, 0], [], []>} : vector<16x32xf32>, vector<32x32xf32>, vector<16x32xf32> -> vector<16x32xf32>
    %c0_15 = arith.constant 0 : index
    %c0_16 = arith.constant 0 : index
    %c0_17 = arith.constant 0 : index
    %37 = vector.load %arg5[%c0_15, %c0_16, %c0_17] : memref<2x1x32xf32, #tpu.memory_space<vmem>>, vector<1x1x32xf32>
    %38 = vector.shape_cast %37 : vector<1x1x32xf32> to vector<1x32xf32>
    %39 = vector.broadcast %38 : vector<1x32xf32> to vector<16x32xf32>
    %40 = arith.addf %36, %39 : vector<16x32xf32>
    %c0_18 = arith.constant 0 : index
    %c0_19 = arith.constant 0 : index
    %c0_20 = arith.constant 0 : index
    %41 = vector.load %arg6[%c0_18, %c0_19, %c0_20] : memref<2x32x32xf32, #tpu.memory_space<vmem>>, vector<1x32x32xf32>
    %42 = vector.shape_cast %41 : vector<1x32x32xf32> to vector<32x32xf32>
    %cst_21 = arith.constant dense<0.000000e+00> : vector<16x32xf32>
    %43 = tpu.matmul %32, %42, %cst_21 {dimension_numbers = #tpu.dot_dimension_numbers<[1], [1], [0], [0], [0, 0, 1, 0], [], []>} : vector<16x32xf32>, vector<32x32xf32>, vector<16x32xf32> -> vector<16x32xf32>
    %c0_22 = arith.constant 0 : index
    %c0_23 = arith.constant 0 : index
    %c0_24 = arith.constant 0 : index
    %44 = vector.load %arg7[%c0_22, %c0_23, %c0_24] : memref<2x1x32xf32, #tpu.memory_space<vmem>>, vector<1x1x32xf32>
    %45 = vector.shape_cast %44 : vector<1x1x32xf32> to vector<1x32xf32>
    %46 = vector.broadcast %45 : vector<1x32xf32> to vector<16x32xf32>
    %47 = arith.addf %43, %46 : vector<16x32xf32>
    %c0_25 = arith.constant 0 : index
    %c0_26 = arith.constant 0 : index
    %c0_27 = arith.constant 0 : index
    %48 = vector.load %arg8[%c0_25, %c0_26, %c0_27] : memref<2x32x32xf32, #tpu.memory_space<vmem>>, vector<1x32x32xf32>
    %49 = vector.shape_cast %48 : vector<1x32x32xf32> to vector<32x32xf32>
    %cst_28 = arith.constant dense<0.000000e+00> : vector<16x32xf32>
    %50 = tpu.matmul %32, %49, %cst_28 {dimension_numbers = #tpu.dot_dimension_numbers<[1], [1], [0], [0], [0, 0, 1, 0], [], []>} : vector<16x32xf32>, vector<32x32xf32>, vector<16x32xf32> -> vector<16x32xf32>
    %c0_29 = arith.constant 0 : index
    %c0_30 = arith.constant 0 : index
    %c0_31 = arith.constant 0 : index
    %51 = vector.load %arg9[%c0_29, %c0_30, %c0_31] : memref<2x1x32xf32, #tpu.memory_space<vmem>>, vector<1x1x32xf32>
    %52 = vector.shape_cast %51 : vector<1x1x32xf32> to vector<1x32xf32>
    %53 = vector.broadcast %52 : vector<1x32xf32> to vector<16x32xf32>
    %54 = arith.addf %50, %53 : vector<16x32xf32>
    %55 = vector.extract_strided_slice %47 {offsets = [0, 0], sizes = [8, 32], strides = [1, 1]} : vector<16x32xf32> to vector<8x32xf32>
    %56 = tpu.concatenate %55, %55 in 0 : vector<8x32xf32>, vector<8x32xf32> -> vector<16x32xf32>
    %57 = arith.mulf %40, %56 : vector<16x32xf32>
    %cst_32 = arith.constant dense<0.000000e+00> : vector<16x32xf32>
    %58 = tpu.matmul %57, %33, %cst_32 {dimension_numbers = #tpu.dot_dimension_numbers<[1], [0], [0], [1], [0, 0, 1, 1], [], []>} : vector<16x32xf32>, vector<32x32xf32>, vector<16x32xf32> -> vector<16x32xf32>
    %59 = vector.extract_strided_slice %47 {offsets = [8, 0], sizes = [8, 32], strides = [1, 1]} : vector<16x32xf32> to vector<8x32xf32>
    %60 = tpu.concatenate %59, %59 in 0 : vector<8x32xf32>, vector<8x32xf32> -> vector<16x32xf32>
    %61 = arith.mulf %40, %60 : vector<16x32xf32>
    %cst_33 = arith.constant dense<0.000000e+00> : vector<16x32xf32>
    %62 = tpu.matmul %61, %33, %cst_33 {dimension_numbers = #tpu.dot_dimension_numbers<[1], [0], [0], [1], [0, 0, 1, 1], [], []>} : vector<16x32xf32>, vector<32x32xf32>, vector<16x32xf32> -> vector<16x32xf32>
    %63 = arith.maximumf %58, %62 : vector<16x32xf32>
    %64 = arith.subf %58, %63 : vector<16x32xf32>
    %65 = math.exp %64 : vector<16x32xf32>
    %66 = arith.subf %62, %63 : vector<16x32xf32>
    %67 = math.exp %66 : vector<16x32xf32>
    %68 = arith.addf %65, %67 : vector<16x32xf32>
    %cst_34 = arith.constant 1.000000e+00 : f32
    %69 = vector.broadcast %cst_34 : f32 to vector<16x32xf32>
    %70 = arith.divf %69, %68 : vector<16x32xf32>
    %cst_35 = arith.constant 0.000000e+00 : f32
    %71 = vector.broadcast %cst_35 : f32 to vector<16x32xf32>
    %72 = vector.extract_strided_slice %54 {offsets = [0, 0], sizes = [8, 32], strides = [1, 1]} : vector<16x32xf32> to vector<8x32xf32>
    %73 = tpu.concatenate %72, %72 in 0 : vector<8x32xf32>, vector<8x32xf32> -> vector<16x32xf32>
    %74 = arith.mulf %65, %70 : vector<16x32xf32>
    %75 = arith.mulf %74, %73 : vector<16x32xf32>
    %76 = arith.addf %71, %75 : vector<16x32xf32>
    %77 = vector.extract_strided_slice %54 {offsets = [8, 0], sizes = [8, 32], strides = [1, 1]} : vector<16x32xf32> to vector<8x32xf32>
    %78 = tpu.concatenate %77, %77 in 0 : vector<8x32xf32>, vector<8x32xf32> -> vector<16x32xf32>
    %79 = arith.mulf %67, %70 : vector<16x32xf32>
    %80 = arith.mulf %79, %78 : vector<16x32xf32>
    %81 = arith.addf %76, %80 : vector<16x32xf32>
    %c0_36 = arith.constant 0 : index
    %c0_37 = arith.constant 0 : index
    %c0_38 = arith.constant 0 : index
    %82 = vector.load %arg10[%c0_36, %c0_37, %c0_38] : memref<2x32x32xf32, #tpu.memory_space<vmem>>, vector<1x32x32xf32>
    %83 = vector.shape_cast %82 : vector<1x32x32xf32> to vector<32x32xf32>
    %cst_39 = arith.constant dense<0.000000e+00> : vector<16x32xf32>
    %84 = tpu.matmul %81, %83, %cst_39 {dimension_numbers = #tpu.dot_dimension_numbers<[1], [1], [0], [0], [0, 0, 1, 0], [], []>} : vector<16x32xf32>, vector<32x32xf32>, vector<16x32xf32> -> vector<16x32xf32>
    %c0_40 = arith.constant 0 : index
    %c0_41 = arith.constant 0 : index
    %c0_42 = arith.constant 0 : index
    %85 = vector.load %arg11[%c0_40, %c0_41, %c0_42] : memref<2x1x32xf32, #tpu.memory_space<vmem>>, vector<1x1x32xf32>
    %86 = vector.shape_cast %85 : vector<1x1x32xf32> to vector<1x32xf32>
    %87 = vector.broadcast %86 : vector<1x32xf32> to vector<16x32xf32>
    %88 = arith.addf %84, %87 : vector<16x32xf32>
    %89 = arith.addf %32, %88 : vector<16x32xf32>
    %c0_43 = arith.constant 0 : index
    %c0_44 = arith.constant 0 : index
    %c0_45 = arith.constant 0 : index
    %90 = vector.load %arg12[%c0_43, %c0_44, %c0_45] : memref<2x1x32xf32, #tpu.memory_space<vmem>>, vector<1x1x32xf32>
    %91 = vector.shape_cast %90 : vector<1x1x32xf32> to vector<1x32xf32>
    %c0_46 = arith.constant 0 : index
    %c0_47 = arith.constant 0 : index
    %c0_48 = arith.constant 0 : index
    %92 = vector.load %arg13[%c0_46, %c0_47, %c0_48] : memref<2x1x32xf32, #tpu.memory_space<vmem>>, vector<1x1x32xf32>
    %93 = vector.shape_cast %92 : vector<1x1x32xf32> to vector<1x32xf32>
    %cst_49 = arith.constant dense<0.000000e+00> : vector<16xf32>
    %94 = vector.multi_reduction <add>, %89, %cst_49 [1] : vector<16x32xf32> to vector<16xf32>
    %95 = vector.shape_cast %94 : vector<16xf32> to vector<16x1xf32>
    %cst_50 = arith.constant 3.200000e+01 : f32
    %96 = vector.broadcast %cst_50 : f32 to vector<16x1xf32>
    %97 = arith.divf %95, %96 : vector<16x1xf32>
    %98 = vector.broadcast %97 : vector<16x1xf32> to vector<16x32xf32>
    %99 = arith.subf %89, %98 : vector<16x32xf32>
    %100 = arith.mulf %99, %99 : vector<16x32xf32>
    %cst_51 = arith.constant dense<0.000000e+00> : vector<16xf32>
    %101 = vector.multi_reduction <add>, %100, %cst_51 [1] : vector<16x32xf32> to vector<16xf32>
    %102 = vector.shape_cast %101 : vector<16xf32> to vector<16x1xf32>
    %cst_52 = arith.constant 3.200000e+01 : f32
    %103 = vector.broadcast %cst_52 : f32 to vector<16x1xf32>
    %104 = arith.divf %102, %103 : vector<16x1xf32>
    %105 = vector.broadcast %97 : vector<16x1xf32> to vector<16x32xf32>
    %106 = arith.subf %89, %105 : vector<16x32xf32>
    %cst_53 = arith.constant 9.99999974E-6 : f32
    %107 = vector.broadcast %cst_53 : f32 to vector<16x1xf32>
    %108 = arith.addf %104, %107 : vector<16x1xf32>
    %109 = math.rsqrt %108 : vector<16x1xf32>
    %110 = vector.broadcast %109 : vector<16x1xf32> to vector<16x32xf32>
    %111 = arith.mulf %106, %110 : vector<16x32xf32>
    %112 = vector.broadcast %91 : vector<1x32xf32> to vector<16x32xf32>
    %113 = arith.mulf %111, %112 : vector<16x32xf32>
    %114 = vector.broadcast %93 : vector<1x32xf32> to vector<16x32xf32>
    %115 = arith.addf %113, %114 : vector<16x32xf32>
    %c0_54 = arith.constant 0 : index
    %c0_55 = arith.constant 0 : index
    %c0_56 = arith.constant 0 : index
    %116 = vector.load %arg14[%c0_54, %c0_55, %c0_56] : memref<2x128x32xf32, #tpu.memory_space<vmem>>, vector<1x128x32xf32>
    %117 = vector.shape_cast %116 : vector<1x128x32xf32> to vector<128x32xf32>
    %cst_57 = arith.constant dense<0.000000e+00> : vector<16x128xf32>
    %118 = tpu.matmul %115, %117, %cst_57 {dimension_numbers = #tpu.dot_dimension_numbers<[1], [1], [0], [0], [0, 0, 1, 0], [], []>} : vector<16x32xf32>, vector<128x32xf32>, vector<16x128xf32> -> vector<16x128xf32>
    %c0_58 = arith.constant 0 : index
    %c0_59 = arith.constant 0 : index
    %c0_60 = arith.constant 0 : index
    %119 = vector.load %arg15[%c0_58, %c0_59, %c0_60] : memref<2x1x128xf32, #tpu.memory_space<vmem>>, vector<1x1x128xf32>
    %120 = vector.shape_cast %119 : vector<1x1x128xf32> to vector<1x128xf32>
    %121 = vector.broadcast %120 : vector<1x128xf32> to vector<16x128xf32>
    %122 = arith.addf %118, %121 : vector<16x128xf32>
    %cst_61 = arith.constant 0.000000e+00 : f32
    %123 = vector.broadcast %cst_61 : f32 to vector<16x128xf32>
    %124 = arith.maximumf %122, %123 : vector<16x128xf32>
    %c0_62 = arith.constant 0 : index
    %c0_63 = arith.constant 0 : index
    %c0_64 = arith.constant 0 : index
    %125 = vector.load %arg16[%c0_62, %c0_63, %c0_64] : memref<2x32x128xf32, #tpu.memory_space<vmem>>, vector<1x32x128xf32>
    %126 = vector.shape_cast %125 : vector<1x32x128xf32> to vector<32x128xf32>
    %cst_65 = arith.constant dense<0.000000e+00> : vector<16x32xf32>
    %127 = tpu.matmul %124, %126, %cst_65 {dimension_numbers = #tpu.dot_dimension_numbers<[1], [1], [0], [0], [0, 0, 1, 0], [], []>} : vector<16x128xf32>, vector<32x128xf32>, vector<16x32xf32> -> vector<16x32xf32>
    %c0_66 = arith.constant 0 : index
    %c0_67 = arith.constant 0 : index
    %c0_68 = arith.constant 0 : index
    %128 = vector.load %arg17[%c0_66, %c0_67, %c0_68] : memref<2x1x32xf32, #tpu.memory_space<vmem>>, vector<1x1x32xf32>
    %129 = vector.shape_cast %128 : vector<1x1x32xf32> to vector<1x32xf32>
    %130 = vector.broadcast %129 : vector<1x32xf32> to vector<16x32xf32>
    %131 = arith.addf %127, %130 : vector<16x32xf32>
    %132 = arith.addf %115, %131 : vector<16x32xf32>
    %c0_69 = arith.constant 0 : index
    %c0_70 = arith.constant 0 : index
    %c0_71 = arith.constant 0 : index
    %133 = vector.load %arg18[%c0_69, %c0_70, %c0_71] : memref<2x1x32xf32, #tpu.memory_space<vmem>>, vector<1x1x32xf32>
    %134 = vector.shape_cast %133 : vector<1x1x32xf32> to vector<1x32xf32>
    %c0_72 = arith.constant 0 : index
    %c0_73 = arith.constant 0 : index
    %c0_74 = arith.constant 0 : index
    %135 = vector.load %arg19[%c0_72, %c0_73, %c0_74] : memref<2x1x32xf32, #tpu.memory_space<vmem>>, vector<1x1x32xf32>
    %136 = vector.shape_cast %135 : vector<1x1x32xf32> to vector<1x32xf32>
    %cst_75 = arith.constant dense<0.000000e+00> : vector<16xf32>
    %137 = vector.multi_reduction <add>, %132, %cst_75 [1] : vector<16x32xf32> to vector<16xf32>
    %138 = vector.shape_cast %137 : vector<16xf32> to vector<16x1xf32>
    %cst_76 = arith.constant 3.200000e+01 : f32
    %139 = vector.broadcast %cst_76 : f32 to vector<16x1xf32>
    %140 = arith.divf %138, %139 : vector<16x1xf32>
    %141 = vector.broadcast %140 : vector<16x1xf32> to vector<16x32xf32>
    %142 = arith.subf %132, %141 : vector<16x32xf32>
    %143 = arith.mulf %142, %142 : vector<16x32xf32>
    %cst_77 = arith.constant dense<0.000000e+00> : vector<16xf32>
    %144 = vector.multi_reduction <add>, %143, %cst_77 [1] : vector<16x32xf32> to vector<16xf32>
    %145 = vector.shape_cast %144 : vector<16xf32> to vector<16x1xf32>
    %cst_78 = arith.constant 3.200000e+01 : f32
    %146 = vector.broadcast %cst_78 : f32 to vector<16x1xf32>
    %147 = arith.divf %145, %146 : vector<16x1xf32>
    %148 = vector.broadcast %140 : vector<16x1xf32> to vector<16x32xf32>
    %149 = arith.subf %132, %148 : vector<16x32xf32>
    %cst_79 = arith.constant 9.99999974E-6 : f32
    %150 = vector.broadcast %cst_79 : f32 to vector<16x1xf32>
    %151 = arith.addf %147, %150 : vector<16x1xf32>
    %152 = math.rsqrt %151 : vector<16x1xf32>
    %153 = vector.broadcast %152 : vector<16x1xf32> to vector<16x32xf32>
    %154 = arith.mulf %149, %153 : vector<16x32xf32>
    %155 = vector.broadcast %134 : vector<1x32xf32> to vector<16x32xf32>
    %156 = arith.mulf %154, %155 : vector<16x32xf32>
    %157 = vector.broadcast %136 : vector<1x32xf32> to vector<16x32xf32>
    %158 = arith.addf %156, %157 : vector<16x32xf32>
    %c1 = arith.constant 1 : index
    %c0_80 = arith.constant 0 : index
    %c0_81 = arith.constant 0 : index
    %159 = vector.load %arg4[%c1, %c0_80, %c0_81] : memref<2x32x32xf32, #tpu.memory_space<vmem>>, vector<1x32x32xf32>
    %160 = vector.shape_cast %159 : vector<1x32x32xf32> to vector<32x32xf32>
    %cst_82 = arith.constant dense<0.000000e+00> : vector<16x32xf32>
    %161 = tpu.matmul %158, %160, %cst_82 {dimension_numbers = #tpu.dot_dimension_numbers<[1], [1], [0], [0], [0, 0, 1, 0], [], []>} : vector<16x32xf32>, vector<32x32xf32>, vector<16x32xf32> -> vector<16x32xf32>
    %c1_83 = arith.constant 1 : index
    %c0_84 = arith.constant 0 : index
    %c0_85 = arith.constant 0 : index
    %162 = vector.load %arg5[%c1_83, %c0_84, %c0_85] : memref<2x1x32xf32, #tpu.memory_space<vmem>>, vector<1x1x32xf32>
    %163 = vector.shape_cast %162 : vector<1x1x32xf32> to vector<1x32xf32>
    %164 = vector.broadcast %163 : vector<1x32xf32> to vector<16x32xf32>
    %165 = arith.addf %161, %164 : vector<16x32xf32>
    %c1_86 = arith.constant 1 : index
    %c0_87 = arith.constant 0 : index
    %c0_88 = arith.constant 0 : index
    %166 = vector.load %arg6[%c1_86, %c0_87, %c0_88] : memref<2x32x32xf32, #tpu.memory_space<vmem>>, vector<1x32x32xf32>
    %167 = vector.shape_cast %166 : vector<1x32x32xf32> to vector<32x32xf32>
    %cst_89 = arith.constant dense<0.000000e+00> : vector<16x32xf32>
    %168 = tpu.matmul %158, %167, %cst_89 {dimension_numbers = #tpu.dot_dimension_numbers<[1], [1], [0], [0], [0, 0, 1, 0], [], []>} : vector<16x32xf32>, vector<32x32xf32>, vector<16x32xf32> -> vector<16x32xf32>
    %c1_90 = arith.constant 1 : index
    %c0_91 = arith.constant 0 : index
    %c0_92 = arith.constant 0 : index
    %169 = vector.load %arg7[%c1_90, %c0_91, %c0_92] : memref<2x1x32xf32, #tpu.memory_space<vmem>>, vector<1x1x32xf32>
    %170 = vector.shape_cast %169 : vector<1x1x32xf32> to vector<1x32xf32>
    %171 = vector.broadcast %170 : vector<1x32xf32> to vector<16x32xf32>
    %172 = arith.addf %168, %171 : vector<16x32xf32>
    %c1_93 = arith.constant 1 : index
    %c0_94 = arith.constant 0 : index
    %c0_95 = arith.constant 0 : index
    %173 = vector.load %arg8[%c1_93, %c0_94, %c0_95] : memref<2x32x32xf32, #tpu.memory_space<vmem>>, vector<1x32x32xf32>
    %174 = vector.shape_cast %173 : vector<1x32x32xf32> to vector<32x32xf32>
    %cst_96 = arith.constant dense<0.000000e+00> : vector<16x32xf32>
    %175 = tpu.matmul %158, %174, %cst_96 {dimension_numbers = #tpu.dot_dimension_numbers<[1], [1], [0], [0], [0, 0, 1, 0], [], []>} : vector<16x32xf32>, vector<32x32xf32>, vector<16x32xf32> -> vector<16x32xf32>
    %c1_97 = arith.constant 1 : index
    %c0_98 = arith.constant 0 : index
    %c0_99 = arith.constant 0 : index
    %176 = vector.load %arg9[%c1_97, %c0_98, %c0_99] : memref<2x1x32xf32, #tpu.memory_space<vmem>>, vector<1x1x32xf32>
    %177 = vector.shape_cast %176 : vector<1x1x32xf32> to vector<1x32xf32>
    %178 = vector.broadcast %177 : vector<1x32xf32> to vector<16x32xf32>
    %179 = arith.addf %175, %178 : vector<16x32xf32>
    %180 = vector.extract_strided_slice %172 {offsets = [0, 0], sizes = [8, 32], strides = [1, 1]} : vector<16x32xf32> to vector<8x32xf32>
    %181 = tpu.concatenate %180, %180 in 0 : vector<8x32xf32>, vector<8x32xf32> -> vector<16x32xf32>
    %182 = arith.mulf %165, %181 : vector<16x32xf32>
    %cst_100 = arith.constant dense<0.000000e+00> : vector<16x32xf32>
    %183 = tpu.matmul %182, %33, %cst_100 {dimension_numbers = #tpu.dot_dimension_numbers<[1], [0], [0], [1], [0, 0, 1, 1], [], []>} : vector<16x32xf32>, vector<32x32xf32>, vector<16x32xf32> -> vector<16x32xf32>
    %184 = vector.extract_strided_slice %172 {offsets = [8, 0], sizes = [8, 32], strides = [1, 1]} : vector<16x32xf32> to vector<8x32xf32>
    %185 = tpu.concatenate %184, %184 in 0 : vector<8x32xf32>, vector<8x32xf32> -> vector<16x32xf32>
    %186 = arith.mulf %165, %185 : vector<16x32xf32>
    %cst_101 = arith.constant dense<0.000000e+00> : vector<16x32xf32>
    %187 = tpu.matmul %186, %33, %cst_101 {dimension_numbers = #tpu.dot_dimension_numbers<[1], [0], [0], [1], [0, 0, 1, 1], [], []>} : vector<16x32xf32>, vector<32x32xf32>, vector<16x32xf32> -> vector<16x32xf32>
    %188 = arith.maximumf %183, %187 : vector<16x32xf32>
    %189 = arith.subf %183, %188 : vector<16x32xf32>
    %190 = math.exp %189 : vector<16x32xf32>
    %191 = arith.subf %187, %188 : vector<16x32xf32>
    %192 = math.exp %191 : vector<16x32xf32>
    %193 = arith.addf %190, %192 : vector<16x32xf32>
    %cst_102 = arith.constant 1.000000e+00 : f32
    %194 = vector.broadcast %cst_102 : f32 to vector<16x32xf32>
    %195 = arith.divf %194, %193 : vector<16x32xf32>
    %cst_103 = arith.constant 0.000000e+00 : f32
    %196 = vector.broadcast %cst_103 : f32 to vector<16x32xf32>
    %197 = vector.extract_strided_slice %179 {offsets = [0, 0], sizes = [8, 32], strides = [1, 1]} : vector<16x32xf32> to vector<8x32xf32>
    %198 = tpu.concatenate %197, %197 in 0 : vector<8x32xf32>, vector<8x32xf32> -> vector<16x32xf32>
    %199 = arith.mulf %190, %195 : vector<16x32xf32>
    %200 = arith.mulf %199, %198 : vector<16x32xf32>
    %201 = arith.addf %196, %200 : vector<16x32xf32>
    %202 = vector.extract_strided_slice %179 {offsets = [8, 0], sizes = [8, 32], strides = [1, 1]} : vector<16x32xf32> to vector<8x32xf32>
    %203 = tpu.concatenate %202, %202 in 0 : vector<8x32xf32>, vector<8x32xf32> -> vector<16x32xf32>
    %204 = arith.mulf %192, %195 : vector<16x32xf32>
    %205 = arith.mulf %204, %203 : vector<16x32xf32>
    %206 = arith.addf %201, %205 : vector<16x32xf32>
    %c1_104 = arith.constant 1 : index
    %c0_105 = arith.constant 0 : index
    %c0_106 = arith.constant 0 : index
    %207 = vector.load %arg10[%c1_104, %c0_105, %c0_106] : memref<2x32x32xf32, #tpu.memory_space<vmem>>, vector<1x32x32xf32>
    %208 = vector.shape_cast %207 : vector<1x32x32xf32> to vector<32x32xf32>
    %cst_107 = arith.constant dense<0.000000e+00> : vector<16x32xf32>
    %209 = tpu.matmul %206, %208, %cst_107 {dimension_numbers = #tpu.dot_dimension_numbers<[1], [1], [0], [0], [0, 0, 1, 0], [], []>} : vector<16x32xf32>, vector<32x32xf32>, vector<16x32xf32> -> vector<16x32xf32>
    %c1_108 = arith.constant 1 : index
    %c0_109 = arith.constant 0 : index
    %c0_110 = arith.constant 0 : index
    %210 = vector.load %arg11[%c1_108, %c0_109, %c0_110] : memref<2x1x32xf32, #tpu.memory_space<vmem>>, vector<1x1x32xf32>
    %211 = vector.shape_cast %210 : vector<1x1x32xf32> to vector<1x32xf32>
    %212 = vector.broadcast %211 : vector<1x32xf32> to vector<16x32xf32>
    %213 = arith.addf %209, %212 : vector<16x32xf32>
    %214 = arith.addf %158, %213 : vector<16x32xf32>
    %c1_111 = arith.constant 1 : index
    %c0_112 = arith.constant 0 : index
    %c0_113 = arith.constant 0 : index
    %215 = vector.load %arg12[%c1_111, %c0_112, %c0_113] : memref<2x1x32xf32, #tpu.memory_space<vmem>>, vector<1x1x32xf32>
    %216 = vector.shape_cast %215 : vector<1x1x32xf32> to vector<1x32xf32>
    %c1_114 = arith.constant 1 : index
    %c0_115 = arith.constant 0 : index
    %c0_116 = arith.constant 0 : index
    %217 = vector.load %arg13[%c1_114, %c0_115, %c0_116] : memref<2x1x32xf32, #tpu.memory_space<vmem>>, vector<1x1x32xf32>
    %218 = vector.shape_cast %217 : vector<1x1x32xf32> to vector<1x32xf32>
    %cst_117 = arith.constant dense<0.000000e+00> : vector<16xf32>
    %219 = vector.multi_reduction <add>, %214, %cst_117 [1] : vector<16x32xf32> to vector<16xf32>
    %220 = vector.shape_cast %219 : vector<16xf32> to vector<16x1xf32>
    %cst_118 = arith.constant 3.200000e+01 : f32
    %221 = vector.broadcast %cst_118 : f32 to vector<16x1xf32>
    %222 = arith.divf %220, %221 : vector<16x1xf32>
    %223 = vector.broadcast %222 : vector<16x1xf32> to vector<16x32xf32>
    %224 = arith.subf %214, %223 : vector<16x32xf32>
    %225 = arith.mulf %224, %224 : vector<16x32xf32>
    %cst_119 = arith.constant dense<0.000000e+00> : vector<16xf32>
    %226 = vector.multi_reduction <add>, %225, %cst_119 [1] : vector<16x32xf32> to vector<16xf32>
    %227 = vector.shape_cast %226 : vector<16xf32> to vector<16x1xf32>
    %cst_120 = arith.constant 3.200000e+01 : f32
    %228 = vector.broadcast %cst_120 : f32 to vector<16x1xf32>
    %229 = arith.divf %227, %228 : vector<16x1xf32>
    %230 = vector.broadcast %222 : vector<16x1xf32> to vector<16x32xf32>
    %231 = arith.subf %214, %230 : vector<16x32xf32>
    %cst_121 = arith.constant 9.99999974E-6 : f32
    %232 = vector.broadcast %cst_121 : f32 to vector<16x1xf32>
    %233 = arith.addf %229, %232 : vector<16x1xf32>
    %234 = math.rsqrt %233 : vector<16x1xf32>
    %235 = vector.broadcast %234 : vector<16x1xf32> to vector<16x32xf32>
    %236 = arith.mulf %231, %235 : vector<16x32xf32>
    %237 = vector.broadcast %216 : vector<1x32xf32> to vector<16x32xf32>
    %238 = arith.mulf %236, %237 : vector<16x32xf32>
    %239 = vector.broadcast %218 : vector<1x32xf32> to vector<16x32xf32>
    %240 = arith.addf %238, %239 : vector<16x32xf32>
    %c1_122 = arith.constant 1 : index
    %c0_123 = arith.constant 0 : index
    %c0_124 = arith.constant 0 : index
    %241 = vector.load %arg14[%c1_122, %c0_123, %c0_124] : memref<2x128x32xf32, #tpu.memory_space<vmem>>, vector<1x128x32xf32>
    %242 = vector.shape_cast %241 : vector<1x128x32xf32> to vector<128x32xf32>
    %cst_125 = arith.constant dense<0.000000e+00> : vector<16x128xf32>
    %243 = tpu.matmul %240, %242, %cst_125 {dimension_numbers = #tpu.dot_dimension_numbers<[1], [1], [0], [0], [0, 0, 1, 0], [], []>} : vector<16x32xf32>, vector<128x32xf32>, vector<16x128xf32> -> vector<16x128xf32>
    %c1_126 = arith.constant 1 : index
    %c0_127 = arith.constant 0 : index
    %c0_128 = arith.constant 0 : index
    %244 = vector.load %arg15[%c1_126, %c0_127, %c0_128] : memref<2x1x128xf32, #tpu.memory_space<vmem>>, vector<1x1x128xf32>
    %245 = vector.shape_cast %244 : vector<1x1x128xf32> to vector<1x128xf32>
    %246 = vector.broadcast %245 : vector<1x128xf32> to vector<16x128xf32>
    %247 = arith.addf %243, %246 : vector<16x128xf32>
    %cst_129 = arith.constant 0.000000e+00 : f32
    %248 = vector.broadcast %cst_129 : f32 to vector<16x128xf32>
    %249 = arith.maximumf %247, %248 : vector<16x128xf32>
    %c1_130 = arith.constant 1 : index
    %c0_131 = arith.constant 0 : index
    %c0_132 = arith.constant 0 : index
    %250 = vector.load %arg16[%c1_130, %c0_131, %c0_132] : memref<2x32x128xf32, #tpu.memory_space<vmem>>, vector<1x32x128xf32>
    %251 = vector.shape_cast %250 : vector<1x32x128xf32> to vector<32x128xf32>
    %cst_133 = arith.constant dense<0.000000e+00> : vector<16x32xf32>
    %252 = tpu.matmul %249, %251, %cst_133 {dimension_numbers = #tpu.dot_dimension_numbers<[1], [1], [0], [0], [0, 0, 1, 0], [], []>} : vector<16x128xf32>, vector<32x128xf32>, vector<16x32xf32> -> vector<16x32xf32>
    %c1_134 = arith.constant 1 : index
    %c0_135 = arith.constant 0 : index
    %c0_136 = arith.constant 0 : index
    %253 = vector.load %arg17[%c1_134, %c0_135, %c0_136] : memref<2x1x32xf32, #tpu.memory_space<vmem>>, vector<1x1x32xf32>
    %254 = vector.shape_cast %253 : vector<1x1x32xf32> to vector<1x32xf32>
    %255 = vector.broadcast %254 : vector<1x32xf32> to vector<16x32xf32>
    %256 = arith.addf %252, %255 : vector<16x32xf32>
    %257 = arith.addf %240, %256 : vector<16x32xf32>
    %c1_137 = arith.constant 1 : index
    %c0_138 = arith.constant 0 : index
    %c0_139 = arith.constant 0 : index
    %258 = vector.load %arg18[%c1_137, %c0_138, %c0_139] : memref<2x1x32xf32, #tpu.memory_space<vmem>>, vector<1x1x32xf32>
    %259 = vector.shape_cast %258 : vector<1x1x32xf32> to vector<1x32xf32>
    %c1_140 = arith.constant 1 : index
    %c0_141 = arith.constant 0 : index
    %c0_142 = arith.constant 0 : index
    %260 = vector.load %arg19[%c1_140, %c0_141, %c0_142] : memref<2x1x32xf32, #tpu.memory_space<vmem>>, vector<1x1x32xf32>
    %261 = vector.shape_cast %260 : vector<1x1x32xf32> to vector<1x32xf32>
    %cst_143 = arith.constant dense<0.000000e+00> : vector<16xf32>
    %262 = vector.multi_reduction <add>, %257, %cst_143 [1] : vector<16x32xf32> to vector<16xf32>
    %263 = vector.shape_cast %262 : vector<16xf32> to vector<16x1xf32>
    %cst_144 = arith.constant 3.200000e+01 : f32
    %264 = vector.broadcast %cst_144 : f32 to vector<16x1xf32>
    %265 = arith.divf %263, %264 : vector<16x1xf32>
    %266 = vector.broadcast %265 : vector<16x1xf32> to vector<16x32xf32>
    %267 = arith.subf %257, %266 : vector<16x32xf32>
    %268 = arith.mulf %267, %267 : vector<16x32xf32>
    %cst_145 = arith.constant dense<0.000000e+00> : vector<16xf32>
    %269 = vector.multi_reduction <add>, %268, %cst_145 [1] : vector<16x32xf32> to vector<16xf32>
    %270 = vector.shape_cast %269 : vector<16xf32> to vector<16x1xf32>
    %cst_146 = arith.constant 3.200000e+01 : f32
    %271 = vector.broadcast %cst_146 : f32 to vector<16x1xf32>
    %272 = arith.divf %270, %271 : vector<16x1xf32>
    %273 = vector.broadcast %265 : vector<16x1xf32> to vector<16x32xf32>
    %274 = arith.subf %257, %273 : vector<16x32xf32>
    %cst_147 = arith.constant 9.99999974E-6 : f32
    %275 = vector.broadcast %cst_147 : f32 to vector<16x1xf32>
    %276 = arith.addf %272, %275 : vector<16x1xf32>
    %277 = math.rsqrt %276 : vector<16x1xf32>
    %278 = vector.broadcast %277 : vector<16x1xf32> to vector<16x32xf32>
    %279 = arith.mulf %274, %278 : vector<16x32xf32>
    %280 = vector.broadcast %259 : vector<1x32xf32> to vector<16x32xf32>
    %281 = arith.mulf %279, %280 : vector<16x32xf32>
    %282 = vector.broadcast %261 : vector<1x32xf32> to vector<16x32xf32>
    %283 = arith.addf %281, %282 : vector<16x32xf32>
    %c0_148 = arith.constant 0 : index
    %c0_149 = arith.constant 0 : index
    %284 = vector.load %arg20[%c0_148, %c0_149] : memref<1x32xf32, #tpu.memory_space<vmem>>, vector<1x32xf32>
    %c0_150 = arith.constant 0 : index
    %c0_151 = arith.constant 0 : index
    %285 = vector.load %arg21[%c0_150, %c0_151] : memref<1x32xf32, #tpu.memory_space<vmem>>, vector<1x32xf32>
    %cst_152 = arith.constant dense<0.000000e+00> : vector<16xf32>
    %286 = vector.multi_reduction <add>, %283, %cst_152 [1] : vector<16x32xf32> to vector<16xf32>
    %287 = vector.shape_cast %286 : vector<16xf32> to vector<16x1xf32>
    %cst_153 = arith.constant 3.200000e+01 : f32
    %288 = vector.broadcast %cst_153 : f32 to vector<16x1xf32>
    %289 = arith.divf %287, %288 : vector<16x1xf32>
    %290 = vector.broadcast %289 : vector<16x1xf32> to vector<16x32xf32>
    %291 = arith.subf %283, %290 : vector<16x32xf32>
    %292 = arith.mulf %291, %291 : vector<16x32xf32>
    %cst_154 = arith.constant dense<0.000000e+00> : vector<16xf32>
    %293 = vector.multi_reduction <add>, %292, %cst_154 [1] : vector<16x32xf32> to vector<16xf32>
    %294 = vector.shape_cast %293 : vector<16xf32> to vector<16x1xf32>
    %cst_155 = arith.constant 3.200000e+01 : f32
    %295 = vector.broadcast %cst_155 : f32 to vector<16x1xf32>
    %296 = arith.divf %294, %295 : vector<16x1xf32>
    %297 = vector.broadcast %289 : vector<16x1xf32> to vector<16x32xf32>
    %298 = arith.subf %283, %297 : vector<16x32xf32>
    %cst_156 = arith.constant 9.99999974E-6 : f32
    %299 = vector.broadcast %cst_156 : f32 to vector<16x1xf32>
    %300 = arith.addf %296, %299 : vector<16x1xf32>
    %301 = math.rsqrt %300 : vector<16x1xf32>
    %302 = vector.broadcast %301 : vector<16x1xf32> to vector<16x32xf32>
    %303 = arith.mulf %298, %302 : vector<16x32xf32>
    %304 = vector.broadcast %284 : vector<1x32xf32> to vector<16x32xf32>
    %305 = arith.mulf %303, %304 : vector<16x32xf32>
    %306 = vector.broadcast %285 : vector<1x32xf32> to vector<16x32xf32>
    %307 = arith.addf %305, %306 : vector<16x32xf32>
    %c0_157 = arith.constant 0 : index
    %c0_158 = arith.constant 0 : index
    %308 = vector.load %arg22[%c0_157, %c0_158] : memref<64x32xf32, #tpu.memory_space<vmem>>, vector<64x32xf32>
    %cst_159 = arith.constant dense<0.000000e+00> : vector<16x64xf32>
    %309 = tpu.matmul %307, %308, %cst_159 {dimension_numbers = #tpu.dot_dimension_numbers<[1], [1], [0], [0], [0, 0, 1, 0], [], []>} : vector<16x32xf32>, vector<64x32xf32>, vector<16x64xf32> -> vector<16x64xf32>
    %310 = vector.shape_cast %309 : vector<16x64xf32> to vector<2x8x64xf32>
    %c0_160 = arith.constant 0 : index
    %c0_161 = arith.constant 0 : index
    %c0_162 = arith.constant 0 : index
    %311 = vector.load %arg23[%c0_160, %c0_161, %c0_162] : memref<2x8x64xf32, #tpu.memory_space<vmem>>, vector<2x8x64xf32>
    tpu.vector_store %arg23[%c0_160, %c0_161, %c0_162], %310 {strides = array<i32>} : memref<2x8x64xf32, #tpu.memory_space<vmem>>, vector<2x8x64xf32>,
    return
  }
}

</mosaic_0001>

<bundles_post_ra>
// kernel: tpu_custom_call.1
= control target key start
LH: loop header
LB: loop body
LE: loop exit
PB: predicated region body
PF: predicated region fallthrough
CT: control target
= control target key end

     0   :  { %s3772_s0 = inlined_call_operand.vmem [shape: s32[16,1], index: 0, kind: input, shape index: {}]   ;;  %s3773_s1 = inlined_call_operand.vmem [shape: f32[64,32], index: 1, kind: input, shape index: {}]   ;;  %s3774_s2 = inlined_call_operand.vmem [shape: f32[16,32], index: 2, kind: input, shape index: {}]   ;;  %s3775_s3 = inlined_call_operand.vmem [shape: f32[32,32], index: 3, kind: input, shape index: {}]   ;;  %s3776_s4 = inlined_call_operand.vmem [shape: f32[2,32,32], index: 4, kind: input, shape index: {}]   ;;  %s3777_s5 = inlined_call_operand.vmem [shape: f32[2,1,32], index: 5, kind: input, shape index: {}]   ;;  %s3778_s6 = inlined_call_operand.vmem [shape: f32[2,32,32], index: 6, kind: input, shape index: {}]   ;;  %s3779_s7 = inlined_call_operand.vmem [shape: f32[2,1,32], index: 7, kind: input, shape index: {}]   ;;  %s3780_s8 = inlined_call_operand.vmem [shape: f32[2,32,32], index: 8, kind: input, shape index: {}]   ;;  %s3781_s9 = inlined_call_operand.vmem [shape: f32[2,1,32], index: 9, kind: input, shape index: {}]   ;;  %s3782_s10 = inlined_call_operand.vmem [shape: f32[2,32,32], index: 10, kind: input, shape index: {}]   ;;  %s3783_s11 = inlined_call_operand.vmem [shape: f32[2,1,32], index: 11, kind: input, shape index: {}]   ;;  %s3784_s12 = inlined_call_operand.vmem [shape: f32[2,1,32], index: 12, kind: input, shape index: {}]   ;;  %s3785_s13 = inlined_call_operand.vmem [shape: f32[2,1,32], index: 13, kind: input, shape index: {}]   ;;  %s3786_s14 = inlined_call_operand.vmem [shape: f32[2,128,32], index: 14, kind: input, shape index: {}]   ;;  %s3787_s15 = inlined_call_operand.vmem [shape: f32[2,1,128], index: 15, kind: input, shape index: {}]   ;;  %s3788_s16 = inlined_call_operand.vmem [shape: f32[2,32,128], index: 16, kind: input, shape index: {}]   ;;  %s3789_s17 = inlined_call_operand.vmem [shape: f32[2,1,32], index: 17, kind: input, shape index: {}]   ;;  %s3790_s18 = inlined_call_operand.vmem [shape: f32[2,1,32], index: 18, kind: input, shape index: {}]   ;;  %s3791_s19 = inlined_call_operand.vmem [shape: f32[2,1,32], index: 19, kind: input, shape index: {}]   ;;  %s3792_s20 = inlined_call_operand.vmem [shape: f32[1,32], index: 20, kind: input, shape index: {}]   ;;  %s3793_s21 = inlined_call_operand.vmem [shape: f32[1,32], index: 21, kind: input, shape index: {}]   ;;  %s3794_s22 = inlined_call_operand.vmem [shape: f32[64,32], index: 22, kind: input, shape index: {}]   ;;  %s3795_s23 = inlined_call_operand.hbm [shape: f32[2,8,64], index: 23, kind: output, shape index: {}]  }
   0x1   :  { %3805 = sst [smem:[#allocation5_spill]] %s3772_s0 }
   0x2   :  { %3806 = sst [smem:[#allocation6_spill]] %s3773_s1 }
   0x3   :  { %3807 = sst [smem:[#allocation7_spill]] %s3774_s2 }
   0x4   :  { %3808 = sst [smem:[#allocation8_spill]] %s3775_s3 }
   0x5   :  { %3809 = sst [smem:[#allocation9_spill]] %s3776_s4 }
   0x6   :  { %3810 = sst [smem:[#allocation10_spill]] %s3777_s5 }
   0x7   :  { %3811 = sst [smem:[#allocation11_spill]] %s3778_s6 }
   0x8   :  { %3812 = sst [smem:[#allocation12_spill]] %s3779_s7 }
   0x9   :  { %3813 = sst [smem:[#allocation13_spill]] %s3790_s18 }
   0xa   :  { %s3814_s24 = sld [smem:[#allocation5_spill]]  ;;  %v77_v2 = vlaneseq  ;;  %v3026_v3 = vmov 0   ;;  %vm134_vm0 = vcmask 130048  }
   0xb   :  { %s3815_s18 = sld [smem:[#allocation6_spill]]  ;;  %2959 = vset.pattern.permute.xlu0 %v3026_v3 }
   0xc   :  { %v78_v6 = vand.u32 127, %v77_v2  ;;  %s3816_s28 = sld [smem:[#allocation7_spill]]  ;;  %v100_v8 = vshrl.u32 %v77_v2, 7 }
   0xe   :  { %v106_v12 = vand.u32 7, %v100_v8  ;;  %v101_v13 = vadd.s32 8, %v100_v8 }
  0x10   :  { %v75_v0 = vld [vmem:[%s3814_s24] sm:$0xff]  ;;  %v76_v9 = vld [vmem:[%s3814_s24 + $0x8] sm:$0xff] }
  0x11   :  { %v98_v1 = vld [vmem:[%s3815_s18 + $0x38] sm:$0xff]  ;;  %v97_v4 = vld [vmem:[%s3815_s18 + $0x30] sm:$0xff]  ;;  %80 = vperm.xlu0 %2959, %v75_v0   ;;  %v96_v5 = vld [vmem:[%s3815_s18 + $0x28] sm:$0xff] }
  0x12   :  { %2692 = vmatprep.subr.mxu1 %v98_v1  ;;  %v133_v7 = vld [vmem:[%s3816_s28 + $0x8] sm:$0xff]  ;;  %v132_v10 = vld [vmem:[%s3816_s28] sm:$0xff] }
  0x13   :  { %2693 = vmatpush3.msra.mxu1 %v98_v1  ;;  %2685 = vmatprep.subr.mxu0 %v133_v7  ;;  %v95_v11 = vld [vmem:[%s3815_s18 + $0x20] sm:$0xff] }
  0x14   :  { %2694 = vmatprep.subr.mxu1 %v97_v4  ;;  %2686 = vmatpush3.msra.mxu0 %v133_v7 }
  0x15   :  { %2695 = vmatpush3.msra.mxu1 %v97_v4  ;;  %2687 = vmatprep.subr.mxu0 %v132_v10 }
  0x16   :  { %2696 = vmatprep.subr.mxu1 %v96_v5 }
  0x17   :  { %28 = vsyncpa [#allocation3], 0  ;;  %83 = vperm.xlu0 %2959, %v76_v9   ;;  %2697 = vmatpush3.msra.mxu1 %v96_v5  ;;  %v94_v14 = vld [vmem:[%s3815_s18 + $0x18] sm:$0xff]  ;;  %vm126_vm1 = vcmp.eq.s32.totalorder %v106_v12, %v78_v6  ;;  %v113_v15 = vand.u32 7, %v101_v13  ;;  %s3817_s2 = sld [smem:[#allocation9_spill]]  ;;  %vm313_vm2 = vcmask 261120  }
  0x18   :  { %2698 = vmatprep.subr.mxu1 %v95_v11  ;;  %2688 = vmatpush3.msra.mxu0 %v132_v10  ;;  %v3027_v17 = vmov 0.0   ;;  %v93_v19 = vld [vmem:[%s3815_s18 + $0x10] sm:$0xff]  ;;  %v92_v22 = vld [vmem:[%s3815_s18 + $0x8] sm:$0xff]  ;;  %v91_v23 = vld [vmem:[%s3815_s18] sm:$0xff]  ;;  %s3818_s1 = sld [smem:[#allocation11_spill]]  ;;  %vm216_vm4 = vcmask 523264  }
  0x19   :  { %v2365_v18 = vsel %vm126_vm1, 1.0, %v3027_v17  ;;  %2699 = vmatpush3.msra.mxu1 %v95_v11  ;;  %vm127_vm3 = vcmp.eq.s32.totalorder %v113_v15, %v78_v6  ;;  %v508_v34 = vld [vmem:[%s3780_s8 + $0x18] sm:$0xff]  ;;  %v507_v41 = vld [vmem:[%s3780_s8 + $0x10] sm:$0xff]  ;;  %v506_v42 = vld [vmem:[%s3780_s8 + $0x8] sm:$0xff]  ;;  %s3819_s7 = sld [smem:[#allocation8_spill]] }
  0x1a   :  { %2689 = vmatprep.mubr.msk.f32.mxu0 %vm134_vm0, %v2365_v18  ;;  %2700 = vmatprep.subr.mxu1 %v94_v14  ;;  %v2366_v20 = vsel %vm127_vm3, 1.0, %v3027_v17  ;;  %v505_v43 = vld [vmem:[%s3780_s8] sm:$0xff]  ;;  %s3820_s5 = sld [smem:[#allocation10_spill]]  ;;  %v804_v62 = vld [vmem:[%s3782_s10 + $0x18] sm:$0xff]  ;;  %v803_v63 = vld [vmem:[%s3782_s10 + $0x10] sm:$0xff] }
  0x1b   :  { %2701 = vmatpush3.msra.mxu1 %v94_v14  ;;  %2690 = vmatmul.mubr.msk.f32.vlgmr.msra.gmra.mxu0 %vm134_vm0, %v2366_v20  ;;  %s3821_s6 = sld [smem:[#allocation12_spill]]  ;;  %v802_v0 = vld [vmem:[%s3782_s10 + $0x8] sm:$0xff]  ;;  %v801_v1 = vld [vmem:[%s3782_s10] sm:$0xff] }
  0x1c   :  { %2702 = vmatprep.subr.mxu1 %v93_v19  ;;  %s3822_s26 = sld [smem:[#allocation13_spill]] }
  0x1d   :  { %v305_v16 = vld [vmem:[%s3817_s2 + $0x18] sm:$0xff]  ;;  %v304_v21 = vld [vmem:[%s3817_s2 + $0x10] sm:$0xff]  ;;  %2703 = vmatpush3.msra.mxu1 %v93_v19  ;;  %v303_v24 = vld [vmem:[%s3817_s2 + $0x8] sm:$0xff] }
  0x1e   :  { %2711 = vmatprep.subr.msk.mxu0 %vm313_vm2, %v305_v16  ;;  %2704 = vmatprep.subr.mxu1 %v92_v22  ;;  %v410_v25 = vld [vmem:[%s3818_s1 + $0x18] sm:$0xff]  ;;  %v409_v30 = vld [vmem:[%s3818_s1 + $0x10] sm:$0xff]  ;;  %v408_v31 = vld [vmem:[%s3818_s1 + $0x8] sm:$0xff] }
  0x1f   :  { %2712 = vmatpush3.xpose.msk.msra.mxu0 %vm313_vm2, %v305_v16  ;;  %2705 = vmatpush3.msra.mxu1 %v92_v22  ;;  %v302_v32 = vld [vmem:[%s3817_s2] sm:$0xff]  ;;  %v3270_v44 = vld [vmem:[%s3819_s7 + $0x18] sm:$0xff]  ;;  %v3279_v45 = vld [vmem:[%s3819_s7 + $0x10] sm:$0xff] }
  0x20   :  { %2713 = vmatprep.subr.msk.mxu0 %vm313_vm2, %v304_v21  ;;  %2706 = vmatprep.subr.mxu1 %v91_v23  ;;  %v407_v33 = vld [vmem:[%s3818_s1] sm:$0xff]  ;;  %v3288_v46 = vld [vmem:[%s3819_s7 + $0x8] sm:$0xff] }
  0x21   :  { %2707 = vmatpush3.msra.mxu1 %v91_v23  ;;  %v3295_v47 = vld [vmem:[%s3819_s7] sm:$0xff] }
  0x22   :  { %2722 = vmatprep.subr.msk.mxu1 %vm313_vm2, %v410_v25  ;;  %v2371_v48 = vld [vmem:[%s3820_s5] ss:$0 sm:$0xff] }
  0x23   :  { %2714 = vmatpush3.xpose.msk.msra.mxu0 %vm313_vm2, %v304_v21  ;;  %v2378_v49 = vld [vmem:[%s3821_s6] ss:$0 sm:$0xff] }
  0x24   :  { %2715 = vmatprep.subr.msk.mxu0 %vm313_vm2, %v303_v24 }
  0x27   :  { %2716 = vmatpush3.xpose.msk.msra.mxu0 %vm313_vm2, %v303_v24  ;;  %v2385_v24 = vld [vmem:[%s3781_s9] ss:$0 sm:$0xff] }
  0x28   :  { %2717 = vmatprep.subr.msk.mxu0 %vm313_vm2, %v302_v32 }
  0x2b   :  { %2718 = vmatpush3.xpose.msk.msra.mxu0 %vm313_vm2, %v302_v32 }
  0x2c   :  { %2733 = vmatprep.subr.msk.mxu0 %vm313_vm2, %v508_v34 }
  0x8c   :  { %v81_v26 = vpop.permute.xlu0 %80 }
  0x8d   :  { %vm85_vm5 = vcmp.eq.s32.totalorder %v81_v26, %v78_v6 }
  0x8e   :  { %v2363_v27 = vsel %vm85_vm5, 1.0, %v3027_v17 }
  0x8f   :  { %2708 = vmatprep.mubr.msk.f32.mxu1 %vm216_vm4, %v2363_v27 }
  0x92   :  { %v84_v28 = vpop.permute.xlu0 %83 }
  0x93   :  { %vm86_vm6 = vcmp.eq.s32.totalorder %v84_v28, %v78_v6 }
  0x94   :  { %v2364_v29 = vsel %vm86_vm6, 1.0, %v3027_v17 }
  0x95   :  { %2709 = vmatmul.mubr.msk.f32.vlgmr.msra.gmra.mxu1 %vm216_vm4, %v2364_v29 }
  0x96   :  { %2723 = vmatpush3.xpose.msk.msra.mxu1 %vm313_vm2, %v410_v25 }
  0x97   :  { %2724 = vmatprep.subr.msk.mxu1 %vm313_vm2, %v409_v30 }
  0x9a   :  { %2725 = vmatpush3.xpose.msk.msra.mxu1 %vm313_vm2, %v409_v30 }
  0x9b   :  { %2726 = vmatprep.subr.msk.mxu1 %vm313_vm2, %v408_v31 }
  0x9e   :  { %2727 = vmatpush3.xpose.msk.msra.mxu1 %vm313_vm2, %v408_v31 }
  0x9f   :  { %2728 = vmatprep.subr.msk.mxu1 %vm313_vm2, %v407_v33 }
  0xa2   :  { %2729 = vmatpush3.xpose.msk.msra.mxu1 %vm313_vm2, %v407_v33 }
  0xa3   :  { %2744 = vmatprep.subr.mxu1 %v3270_v44 }
  0xdb   :  { %v2691_v35 = vpop.f32.mrf.mxu0 }
  0xdd   :  { %v207_v37 = vpop.f32.mrf.mxu0 }
 0x155   :  { %v2710_v36 = vpop.f32.mrf.mxu1 }
 0x156   :  { %v3237_v40 = vadd.f32 %v2710_v36, %v2691_v35 }
 0x157   :  { %v289_v38 = vpop.f32.mrf.mxu1 }
 0x158   :  { %v3235_v39 = vadd.f32 %v289_v38, %v207_v37 }
 0x15a   :  { %2719 = vmatprep.mubr.msk.f32.mxu0 %vm313_vm2, %v3235_v39  ;;  %2730 = vmatprep.mubr.msk.f32.mxu1 %vm313_vm2, %v3235_v39 }
 0x15b   :  { %2720 = vmatmul.mubr.msk.f32.vlgmr.msra.gmra.mxu0 %vm313_vm2, %v3237_v40  ;;  %2731 = vmatmul.mubr.msk.f32.vlgmr.msra.gmra.mxu1 %vm313_vm2, %v3237_v40 }
 0x15c   :  { %2734 = vmatpush3.xpose.msk.msra.mxu0 %vm313_vm2, %v508_v34  ;;  %2741 = vmatprep.mubr.msk.f32.mxu0 %vm313_vm2, %v3235_v39 }
 0x15d   :  { %2735 = vmatprep.subr.msk.mxu0 %vm313_vm2, %v507_v41  ;;  %2745 = vmatpush3.msra.mxu1 %v3270_v44 }
 0x15e   :  { %2746 = vmatprep.subr.mxu1 %v3279_v45 }
 0x15f   :  { %2747 = vmatpush3.msra.mxu1 %v3279_v45 }
 0x160   :  { %2736 = vmatpush3.xpose.msk.msra.mxu0 %vm313_vm2, %v507_v41  ;;  %2748 = vmatprep.subr.mxu1 %v3288_v46 }
 0x161   :  { %2737 = vmatprep.subr.msk.mxu0 %vm313_vm2, %v506_v42  ;;  %2749 = vmatpush3.msra.mxu1 %v3288_v46 }
 0x162   :  { %2750 = vmatprep.subr.mxu1 %v3295_v47 }
 0x163   :  { %2751 = vmatpush3.msra.mxu1 %v3295_v47 }
 0x164   :  { %2738 = vmatpush3.xpose.msk.msra.mxu0 %vm313_vm2, %v506_v42  ;;  %2766 = vmatprep.subr.msk.mxu1 %vm313_vm2, %v804_v62  ;;  %v2396_v42 = vld [vmem:[%s3783_s11] ss:$0 sm:$0xff] }
 0x165   :  { %2739 = vmatprep.subr.msk.mxu0 %vm313_vm2, %v505_v43 }
 0x168   :  { %2740 = vmatpush3.xpose.msk.msra.mxu0 %vm313_vm2, %v505_v43 }
 0x169   :  { %2755 = vmatprep.subr.mxu0 %v3270_v44 }
 0x16b   :  { %2742 = vmatmul.mubr.msk.f32.vlgmr.msra.gmra.mxu0 %vm313_vm2, %v3237_v40 }
 0x16c   :  { %2756 = vmatpush3.msra.mxu0 %v3270_v44 }
 0x16d   :  { %2757 = vmatprep.subr.mxu0 %v3279_v45 }
 0x16e   :  { %2758 = vmatpush3.msra.mxu0 %v3279_v45 }
 0x16f   :  { %2759 = vmatprep.subr.mxu0 %v3288_v46 }
 0x170   :  { %2760 = vmatpush3.msra.mxu0 %v3288_v46 }
 0x171   :  { %2761 = vmatprep.subr.mxu0 %v3295_v47 }
 0x172   :  { %2762 = vmatpush3.msra.mxu0 %v3295_v47 }
 0x21b   :  { %v2721_v50 = vpop.f32.mrf.mxu0  ;;  %v2732_v51 = vpop.f32.mrf.mxu1 }
 0x21c   :  { %v404_v52 = vadd.f32 %v2721_v50, %v2371_v48  ;;  %v502_v53 = vadd.f32 %v2732_v51, %v2378_v49 }
 0x21d   :  { %v398_v54 = vpop.f32.mrf.mxu0  ;;  %v496_v55 = vpop.f32.mrf.mxu1 }
 0x21e   :  { %v399_v56 = vadd.f32 %v2371_v48, %v398_v54  ;;  %v497_v57 = vadd.f32 %v2378_v49, %v496_v55  ;;  %v687_v61 = vmul.f32 %v502_v53, %v404_v52  ;;  %v967_v54 = vld [vmem:[%s3786_s14 + $0x78] sm:$0xff]  ;;  %v966_v55 = vld [vmem:[%s3786_s14 + $0x70] sm:$0xff] }
 0x21f   :  { %2777 = vmatprep.subr.msk.mxu0 %vm313_vm2, %v967_v54 }
 0x220   :  { %v686_v58 = vmul.f32 %v502_v53, %v399_v56  ;;  %v603_v59 = vmul.f32 %v497_v57, %v399_v56  ;;  %v604_v60 = vmul.f32 %v497_v57, %v404_v52  ;;  %v963_v56 = vld [vmem:[%s3786_s14 + $0x58] sm:$0xff]  ;;  %v962_v57 = vld [vmem:[%s3786_s14 + $0x50] sm:$0xff] }
 0x222   :  { %2752 = vmatprep.mubr.msk.f32.mxu1 %vm313_vm2, %v603_v59  ;;  %2763 = vmatprep.mubr.msk.f32.mxu0 %vm313_vm2, %v686_v58  ;;  %v961_v58 = vld [vmem:[%s3786_s14 + $0x48] sm:$0xff]  ;;  %v960_v59 = vld [vmem:[%s3786_s14 + $0x40] sm:$0xff] }
 0x223   :  { %2753 = vmatmul.mubr.msk.f32.vlgmr.msra.gmra.mxu1 %vm313_vm2, %v604_v60  ;;  %2764 = vmatmul.mubr.msk.f32.vlgmr.msra.gmra.mxu0 %vm313_vm2, %v687_v61  ;;  %v959_v60 = vld [vmem:[%s3786_s14 + $0x38] sm:$0xff] }
 0x224   :  { %2767 = vmatpush3.xpose.msk.msra.mxu1 %vm313_vm2, %v804_v62  ;;  %2778 = vmatpush3.xpose.msk.msra.mxu0 %vm313_vm2, %v967_v54 }
 0x225   :  { %2768 = vmatprep.subr.msk.mxu1 %vm313_vm2, %v803_v63  ;;  %2779 = vmatprep.subr.msk.mxu0 %vm313_vm2, %v966_v55 }
 0x228   :  { %2769 = vmatpush3.xpose.msk.msra.mxu1 %vm313_vm2, %v803_v63  ;;  %2780 = vmatpush3.xpose.msk.msra.mxu0 %vm313_vm2, %v966_v55 }
 0x229   :  { %2770 = vmatprep.subr.msk.mxu1 %vm313_vm2, %v802_v0 }
 0x22b   :  { %v2743_v2 = vpop.f32.mrf.mxu0 }
 0x22c   :  { %2771 = vmatpush3.xpose.msk.msra.mxu1 %vm313_vm2, %v802_v0  ;;  %v600_v29 = vadd.f32 %v2743_v2, %v2385_v24 }
 0x22d   :  { %2772 = vmatprep.subr.msk.mxu1 %vm313_vm2, %v801_v1  ;;  %v594_v3 = vpop.f32.mrf.mxu0 }
 0x22e   :  { %v595_v30 = vadd.f32 %v2385_v24, %v594_v3 }
 0x230   :  { %2773 = vmatpush3.xpose.msk.msra.mxu1 %vm313_vm2, %v801_v1 }
 0x2e3   :  { %v2754_v4 = vpop.f32.mrf.mxu1  ;;  %v2765_v5 = vpop.f32.mrf.mxu0 }
 0x2e4   :  { %v770_v6 = vmax.f32 %v2754_v4, %v2765_v5 }
 0x2e5   :  { %v677_v7 = vpop.f32.mrf.mxu1  ;;  %v760_v8 = vpop.f32.mrf.mxu0 }
 0x2e6   :  { %v772_v9 = vsub.f32 %v2754_v4, %v770_v6  ;;  %v778_v10 = vsub.f32 %v2765_v5, %v770_v6  ;;  %v769_v11 = vmax.f32 %v677_v7, %v760_v8 }
 0x2e8   :  { %v775_v12 = vmul.f32 1.442695, %v772_v9  ;;  %v781_v13 = vmul.f32 1.442695, %v778_v10  ;;  %v771_v14 = vsub.f32 %v677_v7, %v769_v11  ;;  %v777_v15 = vsub.f32 %v760_v8, %v769_v11  ;;  %v958_v7 = vld [vmem:[%s3786_s14 + $0x30] sm:$0xff]  ;;  %v957_v8 = vld [vmem:[%s3786_s14 + $0x28] sm:$0xff] }
 0x2e9   :  { %v956_v9 = vld [vmem:[%s3786_s14 + $0x20] sm:$0xff]  ;;  %v955_v10 = vld [vmem:[%s3786_s14 + $0x18] sm:$0xff]  ;;  %v954_v11 = vld [vmem:[%s3786_s14 + $0x10] sm:$0xff] }
 0x2ea   :  { %2960 = vpow2.f32 %v775_v12  ;;  %v773_v16 = vmul.f32 1.442695, %v771_v14  ;;  %v779_v17 = vmul.f32 1.442695, %v777_v15  ;;  %v953_v12 = vld [vmem:[%s3786_s14 + $0x8] sm:$0xff]  ;;  %v1109_v14 = vld [vmem:[%s3788_s16 + $0x18] sm:$0xff] }
 0x2eb   :  { %2962 = vpow2.f32 %v781_v13  ;;  %v952_v13 = vld [vmem:[%s3786_s14] sm:$0xff]  ;;  %v1108_v15 = vld [vmem:[%s3788_s16 + $0x10] sm:$0xff]  ;;  %2812 = vmatprep.subr.mxu1 %v1109_v14 }
 0x2ec   :  { %2964 = vpow2.f32 %v773_v16 }
 0x2ed   :  { %2966 = vpow2.f32 %v779_v17 }
 0x2f7   :  { %v2961_v18 = vpop.eup %2960 }
 0x2f8   :  { %v2963_v19 = vpop.eup %2962 }
 0x2f9   :  { %v2965_v20 = vpop.eup %2964  ;;  %v784_v21 = vadd.f32 %v2963_v19, %v2961_v18 }
 0x2fa   :  { %v2967_v22 = vpop.eup %2966 }
 0x2fb   :  { %2968 = vrcp.f32 %v784_v21  ;;  %v783_v23 = vadd.f32 %v2967_v22, %v2965_v20 }
 0x2fd   :  { %2970 = vrcp.f32 %v783_v23  ;;  %v2403_v23 = vld [vmem:[%s3784_s12] ss:$0 sm:$0xff] }
 0x308   :  { %v2969_v25 = vpop.eup %2968 }
 0x309   :  { %v790_v26 = vmul.f32 %v2969_v25, %v2961_v18  ;;  %v796_v27 = vmul.f32 %v2969_v25, %v2963_v19  ;;  %v2404_v25 = vld [vmem:[%s3785_s13] ss:$0 sm:$0xff] }
 0x30a   :  { %v2971_v28 = vpop.eup %2970 }
 0x30b   :  { %v789_v31 = vmul.f32 %v2971_v28, %v2965_v20  ;;  %v795_v32 = vmul.f32 %v2971_v28, %v2967_v22  ;;  %v792_v33 = vmul.f32 %v790_v26, %v595_v30  ;;  %v798_v34 = vmul.f32 %v796_v27, %v600_v29 }
 0x30d   :  { %v791_v35 = vmul.f32 %v789_v31, %v595_v30  ;;  %v797_v36 = vmul.f32 %v795_v32, %v600_v29  ;;  %v800_v38 = vadd.f32 %v798_v34, %v792_v33  ;;  %v1107_v32 = vld [vmem:[%s3788_s16 + $0x8] sm:$0xff]  ;;  %v1106_v33 = vld [vmem:[%s3788_s16] sm:$0xff] }
 0x30e   :  { %v2405_v34 = vld [vmem:[%s3787_s15] ss:$0 sm:$0xff] }
 0x30f   :  { %v799_v37 = vadd.f32 %v797_v36, %v791_v35 }
 0x311   :  { %2774 = vmatprep.mubr.msk.f32.mxu1 %vm313_vm2, %v799_v37 }
 0x312   :  { %2775 = vmatmul.mubr.msk.f32.vlgmr.msra.gmra.mxu1 %vm313_vm2, %v800_v38 }
 0x313   :  { %2813 = vmatpush3.xpose.msra.mxu1 %v1109_v14  ;;  %v2426_v14 = vld [vmem:[%s3791_s19] ss:$0 sm:$0xff] }
 0x314   :  { %2814 = vmatprep.subr.mxu1 %v1108_v15 }
 0x317   :  { %2815 = vmatpush3.xpose.msra.mxu1 %v1108_v15 }
 0x318   :  { %2816 = vmatprep.subr.mxu1 %v1107_v32 }
 0x31b   :  { %2817 = vmatpush3.xpose.msra.mxu1 %v1107_v32  ;;  %v2444_v32 = vld [vmem:[%s3821_s6 + $0x1] ss:$0 sm:$0xff] }
 0x31c   :  { %2818 = vmatprep.subr.mxu1 %v1106_v33 }
 0x31f   :  { %2819 = vmatpush3.xpose.msra.mxu1 %v1106_v33 }
 0x3d2   :  { %v2776_v41 = vpop.f32.mrf.mxu1 }
 0x3d3   :  { %v902_v48 = vadd.f32 %v2776_v41, %v2396_v42 }
 0x3d4   :  { %v896_v43 = vpop.f32.mrf.mxu1 }
 0x3d5   :  { %v897_v49 = vadd.f32 %v2396_v42, %v896_v43  ;;  %v906_v52 = vadd.f32 %v902_v48, %v3237_v40  ;;  %v964_v40 = vld [vmem:[%s3786_s14 + $0x60] sm:$0xff] }
 0x3d6   :  { %v2424_v48 = vld [vmem:[%s3789_s17] ss:$0 sm:$0xff] }
 0x3d7   :  { %v905_v50 = vadd.f32 %v897_v49, %v3235_v39  ;;  %v912_v53 = vsel %vm313_vm2, %v906_v52, 0.0  ;;  %v965_v39 = vld [vmem:[%s3786_s14 + $0x68] sm:$0xff] }
 0x3d8   :  { %2781 = vmatprep.subr.msk.mxu0 %vm313_vm2, %v965_v39 }
 0x3d9   :  { %v909_v51 = vsel %vm313_vm2, %v905_v50, 0.0  ;;  %2782 = vmatpush3.xpose.msk.msra.mxu0 %vm313_vm2, %v965_v39 }
 0x3da   :  { %910 = vadd.xlane.f32.xlu1 %v909_v51  ;;  %2783 = vmatprep.subr.msk.mxu0 %vm313_vm2, %v964_v40 }
 0x3dd   :  { %2784 = vmatpush3.xpose.msk.msra.mxu0 %vm313_vm2, %v964_v40 }
 0x3de   :  { %913 = vadd.xlane.f32.xlu1 %v912_v53  ;;  %2785 = vmatprep.subr.msk.mxu0 %vm313_vm2, %v963_v56 }
 0x3e1   :  { %2786 = vmatpush3.xpose.msk.msra.mxu0 %vm313_vm2, %v963_v56 }
 0x3e2   :  { %2787 = vmatprep.subr.msk.mxu0 %vm313_vm2, %v962_v57 }
 0x3e5   :  { %2788 = vmatpush3.xpose.msk.msra.mxu0 %vm313_vm2, %v962_v57 }
 0x3e6   :  { %2789 = vmatprep.subr.msk.mxu0 %vm313_vm2, %v961_v58 }
 0x3e9   :  { %2790 = vmatpush3.xpose.msk.msra.mxu0 %vm313_vm2, %v961_v58 }
 0x3ea   :  { %2791 = vmatprep.subr.msk.mxu0 %vm313_vm2, %v960_v59 }
 0x3ed   :  { %2792 = vmatpush3.xpose.msk.msra.mxu0 %vm313_vm2, %v960_v59 }
 0x3ee   :  { %2793 = vmatprep.subr.msk.mxu0 %vm313_vm2, %v959_v60 }
 0x3f1   :  { %2794 = vmatpush3.xpose.msk.msra.mxu0 %vm313_vm2, %v959_v60 }
 0x3f2   :  { %2795 = vmatprep.subr.msk.mxu0 %vm313_vm2, %v958_v7 }
 0x3f5   :  { %2796 = vmatpush3.xpose.msk.msra.mxu0 %vm313_vm2, %v958_v7 }
 0x3f6   :  { %2797 = vmatprep.subr.msk.mxu0 %vm313_vm2, %v957_v8 }
 0x3f9   :  { %2798 = vmatpush3.xpose.msk.msra.mxu0 %vm313_vm2, %v957_v8 }
 0x3fa   :  { %2799 = vmatprep.subr.msk.mxu0 %vm313_vm2, %v956_v9 }
 0x3fd   :  { %2800 = vmatpush3.xpose.msk.msra.mxu0 %vm313_vm2, %v956_v9 }
 0x3fe   :  { %2801 = vmatprep.subr.msk.mxu0 %vm313_vm2, %v955_v10 }
 0x401   :  { %2802 = vmatpush3.xpose.msk.msra.mxu0 %vm313_vm2, %v955_v10 }
 0x402   :  { %2803 = vmatprep.subr.msk.mxu0 %vm313_vm2, %v954_v11 }
 0x405   :  { %2804 = vmatpush3.xpose.msk.msra.mxu0 %vm313_vm2, %v954_v11 }
 0x406   :  { %2805 = vmatprep.subr.msk.mxu0 %vm313_vm2, %v953_v12 }
 0x409   :  { %2806 = vmatpush3.xpose.msk.msra.mxu0 %vm313_vm2, %v953_v12  ;;  %v2425_v12 = vld [vmem:[%s3822_s26] ss:$0 sm:$0xff] }
 0x40a   :  { %2807 = vmatprep.subr.msk.mxu0 %vm313_vm2, %v952_v13 }
 0x40d   :  { %2808 = vmatpush3.xpose.msk.msra.mxu0 %vm313_vm2, %v952_v13 }
 0x40e   :  { %2856 = vmatprep.subr.mxu0 %v3270_v44 }
 0x463   :  { %v911_v61 = vpop.xlane.xlu1 %910 }
 0x464   :  { %v916_v62 = vmul.f32 0.03125, %v911_v61 }
 0x466   :  { %v918_v63 = vsub.f32 %v905_v50, %v916_v62 }
 0x467   :  { %v914_v0 = vpop.xlane.xlu1 %913 }
 0x468   :  { %v917_v1 = vmul.f32 0.03125, %v914_v0  ;;  %v920_v2 = vmul.f32 %v918_v63, %v918_v63  ;;  %v2430_v0 = vld [vmem:[%s3817_s2 + $0x38] sm:$0xff] }
 0x469   :  { %2823 = vmatprep.subr.msk.mxu1 %vm313_vm2, %v2430_v0 }
 0x46a   :  { %v919_v3 = vsub.f32 %v906_v52, %v917_v1  ;;  %v922_v4 = vsel %vm313_vm2, %v920_v2, 0.0  ;;  %v2429_v1 = vld [vmem:[%s3817_s2 + $0x30] sm:$0xff]  ;;  %v2428_v2 = vld [vmem:[%s3817_s2 + $0x28] sm:$0xff] }
 0x46b   :  { %923 = vadd.xlane.f32.xlu0 %v922_v4  ;;  %v2442_v4 = vld [vmem:[%s3818_s1 + $0x38] sm:$0xff] }
 0x46c   :  { %v921_v5 = vmul.f32 %v919_v3, %v919_v3 }
 0x46e   :  { %v925_v6 = vsel %vm313_vm2, %v921_v5, 0.0 }
 0x46f   :  { %926 = vadd.xlane.f32.xlu1 %v925_v6 }
 0x4f4   :  { %v924_v16 = vpop.xlane.xlu0 %923 }
 0x4f5   :  { %v928_v17 = vmul.f32 0.03125, %v924_v16 }
 0x4f7   :  { %v930_v18 = vadd.f32 1e-05, %v928_v17 }
 0x4f8   :  { %v927_v19 = vpop.xlane.xlu1 %926 }
 0x4f9   :  { %2972 = vrsqrt.f32 %v930_v18  ;;  %v929_v20 = vmul.f32 0.03125, %v927_v19 }
 0x4fb   :  { %v931_v21 = vadd.f32 1e-05, %v929_v20 }
 0x4fd   :  { %2974 = vrsqrt.f32 %v931_v21  ;;  %v2441_v21 = vld [vmem:[%s3818_s1 + $0x30] sm:$0xff] }
 0x506   :  { %v2973_v22 = vpop.eup %2972 }
 0x507   :  { %v934_v24 = vmul.f32 %v2973_v22, %v918_v63  ;;  %v2440_v22 = vld [vmem:[%s3818_s1 + $0x28] sm:$0xff] }
 0x509   :  { %v942_v26 = vmul.f32 %v2403_v23, %v934_v24  ;;  %v2454_v24 = vld [vmem:[%s3780_s8 + $0x38] sm:$0xff] }
 0x50a   :  { %v2975_v27 = vpop.eup %2974 }
 0x50b   :  { %v935_v28 = vmul.f32 %v2975_v27, %v919_v3  ;;  %v950_v29 = vadd.f32 %v2404_v25, %v942_v26  ;;  %v2427_v3 = vld [vmem:[%s3817_s2 + $0x20] sm:$0xff]  ;;  %v2452_v26 = vld [vmem:[%s3780_s8 + $0x28] sm:$0xff] }
 0x50c   :  { %v2451_v27 = vld [vmem:[%s3780_s8 + $0x20] sm:$0xff] }
 0x50d   :  { %v943_v30 = vmul.f32 %v2403_v23, %v935_v28  ;;  %2809 = vmatprep.mubr.msk.f32.mxu0 %vm313_vm2, %v950_v29  ;;  %v2439_v23 = vld [vmem:[%s3818_s1 + $0x20] sm:$0xff] }
 0x50f   :  { %v951_v31 = vadd.f32 %v2404_v25, %v943_v30  ;;  %v2453_v25 = vld [vmem:[%s3780_s8 + $0x30] sm:$0xff]  ;;  %v2432_v30 = vld [vmem:[%s3820_s5 + $0x1] ss:$0 sm:$0xff] }
 0x511   :  { %2810 = vmatmul.mubr.msk.f32.vlgmr.msra.gmra.mxu0 %vm313_vm2, %v951_v31 }
 0x512   :  { %2857 = vmatpush3.msra.mxu0 %v3270_v44 }
 0x513   :  { %2858 = vmatprep.subr.mxu0 %v3279_v45 }
 0x514   :  { %2859 = vmatpush3.msra.mxu0 %v3279_v45 }
 0x515   :  { %2860 = vmatprep.subr.mxu0 %v3288_v46 }
 0x516   :  { %2861 = vmatpush3.msra.mxu0 %v3288_v46 }
 0x517   :  { %2862 = vmatprep.subr.mxu0 %v3295_v47 }
 0x518   :  { %2863 = vmatpush3.msra.mxu0 %v3295_v47 }
 0x519   :  { %2867 = vmatprep.subr.mxu0 %v3270_v44 }
 0x5d1   :  { %v2811_v35 = vpop.f32.mrf.mxu0 }
 0x5d2   :  { %v1101_v36 = vadd.f32 %v2811_v35, %v2405_v34 }
 0x5d3   :  { %v1095_v37 = vpop.f32.mrf.mxu0 }
 0x5d4   :  { %v1096_v38 = vadd.f32 %v2405_v34, %v1095_v37  ;;  %v1105_v42 = vmax.f32 %v1101_v36, 0.0 }
 0x5d6   :  { %v1104_v41 = vmax.f32 %v1096_v38, 0.0 }
 0x5d8   :  { %2820 = vmatprep.mubr.f32.mxu1 %v1104_v41 }
 0x5d9   :  { %2821 = vmatmul.mubr.f32.vlgmr.msra.gmra.mxu1 %v1105_v42 }
 0x5da   :  { %2824 = vmatpush3.xpose.msk.msra.mxu1 %vm313_vm2, %v2430_v0 }
 0x5db   :  { %2825 = vmatprep.subr.msk.mxu1 %vm313_vm2, %v2429_v1 }
 0x5de   :  { %2826 = vmatpush3.xpose.msk.msra.mxu1 %vm313_vm2, %v2429_v1 }
 0x5df   :  { %2827 = vmatprep.subr.msk.mxu1 %vm313_vm2, %v2428_v2 }
 0x5e2   :  { %2828 = vmatpush3.xpose.msk.msra.mxu1 %vm313_vm2, %v2428_v2 }
 0x5e3   :  { %2829 = vmatprep.subr.msk.mxu1 %vm313_vm2, %v2427_v3 }
 0x5e6   :  { %2830 = vmatpush3.xpose.msk.msra.mxu1 %vm313_vm2, %v2427_v3  ;;  %v2456_v3 = vld [vmem:[%s3781_s9 + $0x1] ss:$0 sm:$0xff] }
 0x5e7   :  { %2834 = vmatprep.subr.msk.mxu1 %vm313_vm2, %v2442_v4 }
 0x699   :  { %v2822_v43 = vpop.f32.mrf.mxu1 }
 0x69a   :  { %v1189_v50 = vadd.f32 %v2822_v43, %v2424_v48 }
 0x69b   :  { %v1183_v49 = vpop.f32.mrf.mxu1 }
 0x69c   :  { %v1184_v51 = vadd.f32 %v2424_v48, %v1183_v49  ;;  %v1193_v54 = vadd.f32 %v1189_v50, %v951_v31  ;;  %v2469_v48 = vld [vmem:[%s3782_s10 + $0x30] sm:$0xff] }
 0x69e   :  { %v1192_v52 = vadd.f32 %v1184_v51, %v950_v29  ;;  %v1199_v55 = vsel %vm313_vm2, %v1193_v54, 0.0 }
 0x6a0   :  { %v1196_v53 = vsel %vm313_vm2, %v1192_v52, 0.0 }
 0x6a1   :  { %1197 = vadd.xlane.f32.xlu1 %v1196_v53 }
 0x6a5   :  { %1200 = vadd.xlane.f32.xlu1 %v1199_v55 }
 0x72a   :  { %v1198_v39 = vpop.xlane.xlu1 %1197 }
 0x72b   :  { %v1202_v40 = vmul.f32 0.03125, %v1198_v39 }
 0x72d   :  { %v1204_v56 = vsub.f32 %v1192_v52, %v1202_v40 }
 0x72e   :  { %v1201_v57 = vpop.xlane.xlu1 %1200 }
 0x72f   :  { %v1203_v58 = vmul.f32 0.03125, %v1201_v57  ;;  %v1206_v59 = vmul.f32 %v1204_v56, %v1204_v56 }
 0x731   :  { %v1205_v60 = vsub.f32 %v1193_v54, %v1203_v58  ;;  %v1208_v61 = vsel %vm313_vm2, %v1206_v59, 0.0 }
 0x732   :  { %1209 = vadd.xlane.f32.xlu1 %v1208_v61 }
 0x733   :  { %v1207_v62 = vmul.f32 %v1205_v60, %v1205_v60 }
 0x735   :  { %v1211_v63 = vsel %vm313_vm2, %v1207_v62, 0.0 }
 0x736   :  { %1212 = vadd.xlane.f32.xlu1 %v1211_v63 }
 0x7bb   :  { %v1210_v5 = vpop.xlane.xlu1 %1209 }
 0x7bc   :  { %v1214_v6 = vmul.f32 0.03125, %v1210_v5 }
 0x7be   :  { %v1216_v7 = vadd.f32 1e-05, %v1214_v6 }
 0x7bf   :  { %v1213_v8 = vpop.xlane.xlu1 %1212 }
 0x7c0   :  { %2976 = vrsqrt.f32 %v1216_v7  ;;  %v1215_v9 = vmul.f32 0.03125, %v1213_v8 }
 0x7c2   :  { %v1217_v10 = vadd.f32 1e-05, %v1215_v9 }
 0x7c4   :  { %2978 = vrsqrt.f32 %v1217_v10 }
 0x7cd   :  { %v2977_v11 = vpop.eup %2976 }
 0x7ce   :  { %v1220_v13 = vmul.f32 %v2977_v11, %v1204_v56 }
 0x7d0   :  { %v1228_v15 = vmul.f32 %v2425_v12, %v1220_v13 }
 0x7d1   :  { %v2979_v16 = vpop.eup %2978 }
 0x7d2   :  { %v1221_v17 = vmul.f32 %v2979_v16, %v1205_v60  ;;  %v3496_v18 = vadd.f32 %v2426_v14, %v1228_v15 }
 0x7d4   :  { %v1229_v19 = vmul.f32 %v2425_v12, %v1221_v17  ;;  %2831 = vmatprep.mubr.msk.f32.mxu1 %vm313_vm2, %v3496_v18 }
 0x7d6   :  { %v3500_v20 = vadd.f32 %v2426_v14, %v1229_v19 }
 0x7d8   :  { %2832 = vmatmul.mubr.msk.f32.vlgmr.msra.gmra.mxu1 %vm313_vm2, %v3500_v20 }
 0x7d9   :  { %2835 = vmatpush3.xpose.msk.msra.mxu1 %vm313_vm2, %v2442_v4  ;;  %2842 = vmatprep.mubr.msk.f32.mxu1 %vm313_vm2, %v3496_v18 }
 0x7da   :  { %2836 = vmatprep.subr.msk.mxu1 %vm313_vm2, %v2441_v21 }
 0x7dd   :  { %2837 = vmatpush3.xpose.msk.msra.mxu1 %vm313_vm2, %v2441_v21 }
 0x7de   :  { %2838 = vmatprep.subr.msk.mxu1 %vm313_vm2, %v2440_v22 }
 0x7e1   :  { %2839 = vmatpush3.xpose.msk.msra.mxu1 %vm313_vm2, %v2440_v22  ;;  %v2472_v22 = vld [vmem:[%s3783_s11 + $0x1] ss:$0 sm:$0xff] }
 0x7e2   :  { %2840 = vmatprep.subr.msk.mxu1 %vm313_vm2, %v2439_v23 }
 0x7e5   :  { %2841 = vmatpush3.xpose.msk.msra.mxu1 %vm313_vm2, %v2439_v23 }
 0x7e6   :  { %2845 = vmatprep.subr.msk.mxu1 %vm313_vm2, %v2454_v24 }
 0x7e8   :  { %2843 = vmatmul.mubr.msk.f32.vlgmr.msra.gmra.mxu1 %vm313_vm2, %v3500_v20 }
 0x7e9   :  { %2846 = vmatpush3.xpose.msk.msra.mxu1 %vm313_vm2, %v2454_v24  ;;  %2853 = vmatprep.mubr.msk.f32.mxu1 %vm313_vm2, %v3496_v18 }
 0x7ea   :  { %2847 = vmatprep.subr.msk.mxu1 %vm313_vm2, %v2453_v25 }
 0x7ed   :  { %2848 = vmatpush3.xpose.msk.msra.mxu1 %vm313_vm2, %v2453_v25 }
 0x7ee   :  { %2849 = vmatprep.subr.msk.mxu1 %vm313_vm2, %v2452_v26 }
 0x7f1   :  { %2850 = vmatpush3.xpose.msk.msra.mxu1 %vm313_vm2, %v2452_v26 }
 0x7f2   :  { %2851 = vmatprep.subr.msk.mxu1 %vm313_vm2, %v2451_v27 }
 0x7f5   :  { %2852 = vmatpush3.xpose.msk.msra.mxu1 %vm313_vm2, %v2451_v27 }
 0x7f8   :  { %2854 = vmatmul.mubr.msk.f32.vlgmr.msra.gmra.mxu1 %vm313_vm2, %v3500_v20 }
 0x898   :  { %v2833_v28 = vpop.f32.mrf.mxu1 }
 0x899   :  { %v1341_v34 = vadd.f32 %v2833_v28, %v2432_v30 }
 0x89a   :  { %v1335_v29 = vpop.f32.mrf.mxu1 }
 0x89b   :  { %v1336_v35 = vadd.f32 %v2432_v30, %v1335_v29  ;;  %v2498_v30 = vld [vmem:[%s3786_s14 + $0xf8] sm:$0xff] }
 0x8a8   :  { %v2844_v31 = vpop.f32.mrf.mxu1 }
 0x8a9   :  { %v1441_v36 = vadd.f32 %v2844_v31, %v2444_v32  ;;  %v2497_v31 = vld [vmem:[%s3786_s14 + $0xf0] sm:$0xff] }
 0x8aa   :  { %v1435_v33 = vpop.f32.mrf.mxu1 }
 0x8ab   :  { %v1436_v37 = vadd.f32 %v2444_v32, %v1435_v33  ;;  %v1627_v42 = vmul.f32 %v1441_v36, %v1336_v35  ;;  %v1628_v43 = vmul.f32 %v1441_v36, %v1341_v34  ;;  %v2494_v32 = vld [vmem:[%s3786_s14 + $0xd8] sm:$0xff]  ;;  %v2493_v33 = vld [vmem:[%s3786_s14 + $0xd0] sm:$0xff] }
 0x8ac   :  { %v2490_v36 = vld [vmem:[%s3786_s14 + $0xb8] sm:$0xff] }
 0x8ad   :  { %v1544_v38 = vmul.f32 %v1436_v37, %v1336_v35  ;;  %v1545_v41 = vmul.f32 %v1436_v37, %v1341_v34  ;;  %v2492_v34 = vld [vmem:[%s3786_s14 + $0xc8] sm:$0xff]  ;;  %v2491_v35 = vld [vmem:[%s3786_s14 + $0xc0] sm:$0xff] }
 0x8af   :  { %2864 = vmatprep.mubr.msk.f32.mxu0 %vm313_vm2, %v1544_v38 }
 0x8b0   :  { %2865 = vmatmul.mubr.msk.f32.vlgmr.msra.gmra.mxu0 %vm313_vm2, %v1545_v41 }
 0x8b1   :  { %2868 = vmatpush3.msra.mxu0 %v3270_v44  ;;  %2875 = vmatprep.mubr.msk.f32.mxu0 %vm313_vm2, %v1627_v42  ;;  %v2470_v44 = vld [vmem:[%s3782_s10 + $0x38] sm:$0xff] }
 0x8b2   :  { %2869 = vmatprep.subr.mxu0 %v3279_v45  ;;  %2878 = vmatprep.subr.msk.mxu1 %vm313_vm2, %v2470_v44 }
 0x8b3   :  { %2870 = vmatpush3.msra.mxu0 %v3279_v45  ;;  %2879 = vmatpush3.xpose.msk.msra.mxu1 %vm313_vm2, %v2470_v44  ;;  %v2468_v45 = vld [vmem:[%s3782_s10 + $0x28] sm:$0xff] }
 0x8b4   :  { %2871 = vmatprep.subr.mxu0 %v3288_v46  ;;  %2880 = vmatprep.subr.msk.mxu1 %vm313_vm2, %v2469_v48 }
 0x8b5   :  { %2872 = vmatpush3.msra.mxu0 %v3288_v46  ;;  %v2467_v46 = vld [vmem:[%s3782_s10 + $0x20] sm:$0xff] }
 0x8b6   :  { %2873 = vmatprep.subr.mxu0 %v3295_v47 }
 0x8b7   :  { %2874 = vmatpush3.msra.mxu0 %v3295_v47  ;;  %2881 = vmatpush3.xpose.msk.msra.mxu1 %vm313_vm2, %v2469_v48 }
 0x8b8   :  { %2876 = vmatmul.mubr.msk.f32.vlgmr.msra.gmra.mxu0 %vm313_vm2, %v1628_v43  ;;  %2882 = vmatprep.subr.msk.mxu1 %vm313_vm2, %v2468_v45  ;;  %v2855_v2 = vpop.f32.mrf.mxu1 }
 0x8b9   :  { %v1541_v9 = vadd.f32 %v2855_v2, %v2456_v3  ;;  %2889 = vmatprep.subr.msk.mxu0 %vm313_vm2, %v2498_v30 }
 0x8ba   :  { %v1535_v4 = vpop.f32.mrf.mxu1  ;;  %2890 = vmatpush3.xpose.msk.msra.mxu0 %vm313_vm2, %v2498_v30 }
 0x8bb   :  { %2883 = vmatpush3.xpose.msk.msra.mxu1 %vm313_vm2, %v2468_v45  ;;  %v1536_v10 = vadd.f32 %v2456_v3, %v1535_v4  ;;  %2891 = vmatprep.subr.msk.mxu0 %vm313_vm2, %v2497_v31 }
 0x8bc   :  { %2884 = vmatprep.subr.msk.mxu1 %vm313_vm2, %v2467_v46 }
 0x8be   :  { %2892 = vmatpush3.xpose.msk.msra.mxu0 %vm313_vm2, %v2497_v31 }
 0x8bf   :  { %2885 = vmatpush3.xpose.msk.msra.mxu1 %vm313_vm2, %v2467_v46 }
 0x970   :  { %v2866_v47 = vpop.f32.mrf.mxu0 }
 0x972   :  { %v1618_v49 = vpop.f32.mrf.mxu0 }
 0x978   :  { %v2877_v50 = vpop.f32.mrf.mxu0 }
 0x979   :  { %v1711_v51 = vmax.f32 %v2866_v47, %v2877_v50 }
 0x97a   :  { %v1701_v52 = vpop.f32.mrf.mxu0 }
 0x97b   :  { %v1713_v53 = vsub.f32 %v2866_v47, %v1711_v51  ;;  %v1719_v54 = vsub.f32 %v2877_v50, %v1711_v51  ;;  %v1710_v55 = vmax.f32 %v1618_v49, %v1701_v52  ;;  %v2488_v50 = vld [vmem:[%s3786_s14 + $0xa8] sm:$0xff]  ;;  %v2487_v51 = vld [vmem:[%s3786_s14 + $0xa0] sm:$0xff] }
 0x97d   :  { %v1716_v39 = vmul.f32 1.442695, %v1713_v53  ;;  %v1722_v40 = vmul.f32 1.442695, %v1719_v54  ;;  %v1712_v56 = vsub.f32 %v1618_v49, %v1710_v55  ;;  %v1718_v57 = vsub.f32 %v1701_v52, %v1710_v55  ;;  %v2489_v49 = vld [vmem:[%s3786_s14 + $0xb0] sm:$0xff]  ;;  %v2486_v52 = vld [vmem:[%s3786_s14 + $0x98] sm:$0xff] }
 0x97e   :  { %v2485_v53 = vld [vmem:[%s3786_s14 + $0x90] sm:$0xff]  ;;  %v2484_v54 = vld [vmem:[%s3786_s14 + $0x88] sm:$0xff]  ;;  %v2483_v55 = vld [vmem:[%s3786_s14 + $0x80] sm:$0xff] }
 0x97f   :  { %2980 = vpow2.f32 %v1716_v39  ;;  %v1714_v58 = vmul.f32 1.442695, %v1712_v56  ;;  %v1720_v59 = vmul.f32 1.442695, %v1718_v57  ;;  %v2522_v39 = vld [vmem:[%s3788_s16 + $0x38] sm:$0xff] }
 0x980   :  { %2982 = vpow2.f32 %v1722_v40  ;;  %v2521_v40 = vld [vmem:[%s3788_s16 + $0x30] sm:$0xff]  ;;  %2924 = vmatprep.subr.mxu1 %v2522_v39 }
 0x981   :  { %2984 = vpow2.f32 %v1714_v58 }
 0x982   :  { %2986 = vpow2.f32 %v1720_v59 }
 0x98c   :  { %v2981_v60 = vpop.eup %2980 }
 0x98d   :  { %v2983_v61 = vpop.eup %2982 }
 0x98e   :  { %v2985_v62 = vpop.eup %2984  ;;  %v1725_v63 = vadd.f32 %v2983_v61, %v2981_v60 }
 0x98f   :  { %v2987_v0 = vpop.eup %2986 }
 0x990   :  { %2988 = vrcp.f32 %v1725_v63  ;;  %v1724_v1 = vadd.f32 %v2987_v0, %v2985_v62  ;;  %v2481_v63 = vld [vmem:[%s3784_s12 + $0x1] ss:$0 sm:$0xff] }
 0x992   :  { %2990 = vrcp.f32 %v1724_v1  ;;  %v2482_v1 = vld [vmem:[%s3785_s13 + $0x1] ss:$0 sm:$0xff]  ;;  %s3028_s13 = smov [#allocation2]  }
 0x993   :  { %s2352_s11 = sshll.u32 %s3028_s13, 4  ;;  %s2353_s11 = int_to_ptr.vmem [resolvable:$true] %s2352_s11 }
 0x994   :  { %p3009_p1 = scmp.lt.s32.totalorder %s2353_s11, %s2353_s11 }
 0x99d   :  { %v2989_v5 = vpop.eup %2988 }
 0x99e   :  { %v1731_v6 = vmul.f32 %v2989_v5, %v2981_v60  ;;  %v1737_v7 = vmul.f32 %v2989_v5, %v2983_v61 }
 0x99f   :  { %v2991_v8 = vpop.eup %2990 }
 0x9a0   :  { %v1730_v11 = vmul.f32 %v2991_v8, %v2985_v62  ;;  %v1736_v12 = vmul.f32 %v2991_v8, %v2987_v0  ;;  %v1733_v13 = vmul.f32 %v1731_v6, %v1536_v10  ;;  %v1739_v14 = vmul.f32 %v1737_v7, %v1541_v9  ;;  %v2520_v8 = vld [vmem:[%s3788_s16 + $0x28] sm:$0xff] }
 0x9a2   :  { %v1732_v15 = vmul.f32 %v1730_v11, %v1536_v10  ;;  %v1738_v16 = vmul.f32 %v1736_v12, %v1541_v9  ;;  %v1741_v19 = vadd.f32 %v1739_v14, %v1733_v13  ;;  %v2519_v9 = vld [vmem:[%s3788_s16 + $0x20] sm:$0xff] }
 0x9a3   :  { %v2500_v10 = vld [vmem:[%s3787_s15 + $0x1] ss:$0 sm:$0xff] }
 0x9a4   :  { %v1740_v17 = vadd.f32 %v1738_v16, %v1732_v15 }
 0x9a6   :  { %2886 = vmatprep.mubr.msk.f32.mxu1 %vm313_vm2, %v1740_v17  ;;  %v2524_v17 = vld [vmem:[%s3789_s17 + $0x1] ss:$0 sm:$0xff] }
 0x9a7   :  { %2887 = vmatmul.mubr.msk.f32.vlgmr.msra.gmra.mxu1 %vm313_vm2, %v1741_v19 }
 0x9a8   :  { %2925 = vmatpush3.xpose.msra.mxu1 %v2522_v39  ;;  %v2239_v39 = vld [vmem:[%s3794_s22 + $0x38] sm:$0xff] }
 0x9a9   :  { %2926 = vmatprep.subr.mxu1 %v2521_v40 }
 0x9ac   :  { %2927 = vmatpush3.xpose.msra.mxu1 %v2521_v40  ;;  %v2238_v40 = vld [vmem:[%s3794_s22 + $0x30] sm:$0xff] }
 0x9ad   :  { %2928 = vmatprep.subr.mxu1 %v2520_v8 }
 0x9b0   :  { %2929 = vmatpush3.xpose.msra.mxu1 %v2520_v8 }
 0x9b1   :  { %2930 = vmatprep.subr.mxu1 %v2519_v9 }
 0x9b4   :  { %2931 = vmatpush3.xpose.msra.mxu1 %v2519_v9 }
 0x9b5   :  { %2935 = vmatprep.subr.msk.mxu1 %vm313_vm2, %v2239_v39 }
 0xa67   :  { %v2888_v21 = vpop.f32.mrf.mxu1 }
 0xa68   :  { %v1845_v24 = vadd.f32 %v2888_v21, %v2472_v22 }
 0xa69   :  { %v1839_v23 = vpop.f32.mrf.mxu1 }
 0xa6a   :  { %v1840_v25 = vadd.f32 %v2472_v22, %v1839_v23  ;;  %v1849_v28 = vadd.f32 %v1845_v24, %v3500_v20  ;;  %v2495_v20 = vld [vmem:[%s3786_s14 + $0xe0] sm:$0xff] }
 0xa6c   :  { %v1848_v26 = vadd.f32 %v1840_v25, %v3496_v18  ;;  %v1857_v29 = vsel %vm313_vm2, %v1849_v28, 0.0  ;;  %v2496_v18 = vld [vmem:[%s3786_s14 + $0xe8] sm:$0xff] }
 0xa6d   :  { %2893 = vmatprep.subr.msk.mxu0 %vm313_vm2, %v2496_v18 }
 0xa6e   :  { %v1854_v27 = vsel %vm313_vm2, %v1848_v26, 0.0  ;;  %2894 = vmatpush3.xpose.msk.msra.mxu0 %vm313_vm2, %v2496_v18 }
 0xa6f   :  { %1855 = vadd.xlane.f32.xlu1 %v1854_v27  ;;  %2895 = vmatprep.subr.msk.mxu0 %vm313_vm2, %v2495_v20 }
 0xa72   :  { %2896 = vmatpush3.xpose.msk.msra.mxu0 %vm313_vm2, %v2495_v20 }
 0xa73   :  { %1858 = vadd.xlane.f32.xlu1 %v1857_v29  ;;  %2897 = vmatprep.subr.msk.mxu0 %vm313_vm2, %v2494_v32 }
 0xa76   :  { %2898 = vmatpush3.xpose.msk.msra.mxu0 %vm313_vm2, %v2494_v32 }
 0xa77   :  { %2899 = vmatprep.subr.msk.mxu0 %vm313_vm2, %v2493_v33 }
 0xa7a   :  { %2900 = vmatpush3.xpose.msk.msra.mxu0 %vm313_vm2, %v2493_v33 }
 0xa7b   :  { %2901 = vmatprep.subr.msk.mxu0 %vm313_vm2, %v2492_v34 }
 0xa7e   :  { %2902 = vmatpush3.xpose.msk.msra.mxu0 %vm313_vm2, %v2492_v34 }
 0xa7f   :  { %2903 = vmatprep.subr.msk.mxu0 %vm313_vm2, %v2491_v35 }
 0xa82   :  { %2904 = vmatpush3.xpose.msk.msra.mxu0 %vm313_vm2, %v2491_v35 }
 0xa83   :  { %2905 = vmatprep.subr.msk.mxu0 %vm313_vm2, %v2490_v36 }
 0xa86   :  { %2906 = vmatpush3.xpose.msk.msra.mxu0 %vm313_vm2, %v2490_v36 }
 0xa87   :  { %2907 = vmatprep.subr.msk.mxu0 %vm313_vm2, %v2489_v49 }
 0xa8a   :  { %2908 = vmatpush3.xpose.msk.msra.mxu0 %vm313_vm2, %v2489_v49 }
 0xa8b   :  { %2909 = vmatprep.subr.msk.mxu0 %vm313_vm2, %v2488_v50 }
 0xa8e   :  { %2910 = vmatpush3.xpose.msk.msra.mxu0 %vm313_vm2, %v2488_v50 }
 0xa8f   :  { %2911 = vmatprep.subr.msk.mxu0 %vm313_vm2, %v2487_v51 }
 0xa92   :  { %2912 = vmatpush3.xpose.msk.msra.mxu0 %vm313_vm2, %v2487_v51 }
 0xa93   :  { %2913 = vmatprep.subr.msk.mxu0 %vm313_vm2, %v2486_v52 }
 0xa96   :  { %2914 = vmatpush3.xpose.msk.msra.mxu0 %vm313_vm2, %v2486_v52 }
 0xa97   :  { %2915 = vmatprep.subr.msk.mxu0 %vm313_vm2, %v2485_v53 }
 0xa9a   :  { %2916 = vmatpush3.xpose.msk.msra.mxu0 %vm313_vm2, %v2485_v53 }
 0xa9b   :  { %2917 = vmatprep.subr.msk.mxu0 %vm313_vm2, %v2484_v54 }
 0xa9e   :  { %2918 = vmatpush3.xpose.msk.msra.mxu0 %vm313_vm2, %v2484_v54 }
 0xa9f   :  { %2919 = vmatprep.subr.msk.mxu0 %vm313_vm2, %v2483_v55 }
 0xaa2   :  { %2920 = vmatpush3.xpose.msk.msra.mxu0 %vm313_vm2, %v2483_v55 }
 0xaf8   :  { %v1856_v37 = vpop.xlane.xlu1 %1855 }
 0xaf9   :  { %v1860_v38 = vmul.f32 0.03125, %v1856_v37 }
 0xafb   :  { %v1862_v41 = vsub.f32 %v1848_v26, %v1860_v38 }
 0xafc   :  { %v1859_v42 = vpop.xlane.xlu1 %1858 }
 0xafd   :  { %v1861_v43 = vmul.f32 0.03125, %v1859_v42  ;;  %v1864_v44 = vmul.f32 %v1862_v41, %v1862_v41 }
 0xaff   :  { %v1863_v48 = vsub.f32 %v1849_v28, %v1861_v43  ;;  %v1866_v45 = vsel %vm313_vm2, %v1864_v44, 0.0 }
 0xb00   :  { %1867 = vadd.xlane.f32.xlu1 %v1866_v45 }
 0xb01   :  { %v1865_v46 = vmul.f32 %v1863_v48, %v1863_v48 }
 0xb03   :  { %v1869_v47 = vsel %vm313_vm2, %v1865_v46, 0.0 }
 0xb04   :  { %1870 = vadd.xlane.f32.xlu0 %v1869_v47  ;;  %v2528_v47 = vld [vmem:[%s3791_s19 + $0x1] ss:$0 sm:$0xff] }
 0xb89   :  { %v1868_v56 = vpop.xlane.xlu1 %1867 }
 0xb8a   :  { %v1872_v57 = vmul.f32 0.03125, %v1868_v56 }
 0xb8c   :  { %v1874_v58 = vadd.f32 1e-05, %v1872_v57 }
 0xb8d   :  { %v1871_v59 = vpop.xlane.xlu0 %1870 }
 0xb8e   :  { %2992 = vrsqrt.f32 %v1874_v58  ;;  %v1873_v60 = vmul.f32 0.03125, %v1871_v59 }
 0xb90   :  { %v1875_v61 = vadd.f32 1e-05, %v1873_v60 }
 0xb92   :  { %2994 = vrsqrt.f32 %v1875_v61 }
 0xb9b   :  { %v2993_v62 = vpop.eup %2992 }
 0xb9c   :  { %v1878_v0 = vmul.f32 %v2993_v62, %v1862_v41 }
 0xb9e   :  { %v1886_v2 = vmul.f32 %v2481_v63, %v1878_v0 }
 0xb9f   :  { %v2995_v3 = vpop.eup %2994 }
 0xba0   :  { %v1879_v4 = vmul.f32 %v2995_v3, %v1863_v48  ;;  %v1894_v5 = vadd.f32 %v2482_v1, %v1886_v2  ;;  %v2527_v48 = vld [vmem:[%s3822_s26 + $0x1] ss:$0 sm:$0xff]  ;;  %v2237_v2 = vld [vmem:[%s3794_s22 + $0x28] sm:$0xff] }
 0xba1   :  { %v2236_v3 = vld [vmem:[%s3794_s22 + $0x20] sm:$0xff] }
 0xba2   :  { %v1887_v6 = vmul.f32 %v2481_v63, %v1879_v4  ;;  %2921 = vmatprep.mubr.msk.f32.mxu0 %vm313_vm2, %v1894_v5  ;;  %v2235_v4 = vld [vmem:[%s3794_s22 + $0x18] sm:$0xff] }
 0xba4   :  { %v1895_v7 = vadd.f32 %v2482_v1, %v1887_v6  ;;  %v2233_v6 = vld [vmem:[%s3794_s22 + $0x8] sm:$0xff] }
 0xba6   :  { %2922 = vmatmul.mubr.msk.f32.vlgmr.msra.gmra.mxu0 %vm313_vm2, %v1895_v7 }
 0xc66   :  { %v2923_v11 = vpop.f32.mrf.mxu0 }
 0xc67   :  { %v2047_v12 = vadd.f32 %v2923_v11, %v2500_v10 }
 0xc68   :  { %v2041_v13 = vpop.f32.mrf.mxu0 }
 0xc69   :  { %v2042_v14 = vadd.f32 %v2500_v10, %v2041_v13  ;;  %v2051_v16 = vmax.f32 %v2047_v12, 0.0 }
 0xc6b   :  { %v2050_v15 = vmax.f32 %v2042_v14, 0.0 }
 0xc6d   :  { %2932 = vmatprep.mubr.f32.mxu1 %v2050_v15  ;;  %v2529_v15 = vld [vmem:[%s3792_s20] ss:$0 sm:$0xff]  ;;  %s3004_s20 = scalar_lea.vmem %s2353_s11, 256 }
 0xc6e   :  { %2933 = vmatmul.mubr.f32.vlgmr.msra.gmra.mxu1 %v2051_v16  ;;  %p3005_p0 = scmp.ne.s32.totalorder %s2353_s11, %s3004_s20  ;;  %p3010_p2 = scmp.lt.s32.totalorder %s3004_s20, %s3004_s20 }
 0xc6f   :  { %2936 = vmatpush3.xpose.msk.msra.mxu1 %vm313_vm2, %v2239_v39 }
 0xc70   :  { %2937 = vmatprep.subr.msk.mxu1 %vm313_vm2, %v2238_v40  ;;  %p3011_p3 = por %p3010_p2, %p3009_p1 }
 0xc72   :  { %p3012_p4 = pnand %p3011_p3, %p3005_p0 }
 0xc73   :  { %2938 = vmatpush3.xpose.msk.msra.mxu1 %vm313_vm2, %v2238_v40 }
 0xc74   :  { %2939 = vmatprep.subr.msk.mxu1 %vm313_vm2, %v2237_v2 }
 0xc77   :  { %2940 = vmatpush3.xpose.msk.msra.mxu1 %vm313_vm2, %v2237_v2 }
 0xc78   :  { %2941 = vmatprep.subr.msk.mxu1 %vm313_vm2, %v2236_v3 }
 0xc7b   :  { %2942 = vmatpush3.xpose.msk.msra.mxu1 %vm313_vm2, %v2236_v3 }
 0xc7c   :  { %2943 = vmatprep.subr.msk.mxu1 %vm313_vm2, %v2235_v4 }
 0xc7f   :  { %2944 = vmatpush3.xpose.msk.msra.mxu1 %vm313_vm2, %v2235_v4 }
 0xd2e   :  { %v2934_v19 = vpop.f32.mrf.mxu1 }
 0xd2f   :  { %v2137_v21 = vadd.f32 %v2934_v19, %v2524_v17 }
 0xd30   :  { %v2131_v22 = vpop.f32.mrf.mxu1 }
 0xd31   :  { %v2132_v23 = vadd.f32 %v2524_v17, %v2131_v22  ;;  %v2141_v24 = vadd.f32 %v2137_v21, %v1895_v7  ;;  %v2232_v7 = vld [vmem:[%s3794_s22] sm:$0xff] }
 0xd32   :  { %v2530_v22 = vld [vmem:[%s3793_s21] ss:$0 sm:$0xff] }
 0xd33   :  { %v2149_v25 = vsel %vm313_vm2, %v2141_v24, 0.0  ;;  %v2140_v26 = vadd.f32 %v2132_v23, %v1894_v5  ;;  %v2234_v5 = vld [vmem:[%s3794_s22 + $0x10] sm:$0xff] }
 0xd34   :  { %2150 = vadd.xlane.f32.xlu0 %v2149_v25  ;;  %2945 = vmatprep.subr.msk.mxu1 %vm313_vm2, %v2234_v5 }
 0xd35   :  { %v2146_v27 = vsel %vm313_vm2, %v2140_v26, 0.0  ;;  %2946 = vmatpush3.xpose.msk.msra.mxu1 %vm313_vm2, %v2234_v5 }
 0xd36   :  { %2147 = vadd.xlane.f32.xlu1 %v2146_v27  ;;  %2947 = vmatprep.subr.msk.mxu1 %vm313_vm2, %v2233_v6 }
 0xd39   :  { %2948 = vmatpush3.xpose.msk.msra.mxu1 %vm313_vm2, %v2233_v6 }
 0xd3a   :  { %2949 = vmatprep.subr.msk.mxu1 %vm313_vm2, %v2232_v7 }
 0xd3d   :  { %2950 = vmatpush3.xpose.msk.msra.mxu1 %vm313_vm2, %v2232_v7 }
 0xdbd   :  { %v2151_v28 = vpop.xlane.xlu0 %2150 }
 0xdbe   :  { %v2153_v29 = vmul.f32 0.03125, %v2151_v28 }
 0xdbf   :  { %v2148_v30 = vpop.xlane.xlu1 %2147 }
 0xdc0   :  { %v2155_v31 = vsub.f32 %v2141_v24, %v2153_v29  ;;  %v2152_v18 = vmul.f32 0.03125, %v2148_v30 }
 0xdc2   :  { %v2154_v20 = vsub.f32 %v2140_v26, %v2152_v18  ;;  %v2157_v32 = vmul.f32 %v2155_v31, %v2155_v31 }
 0xdc4   :  { %v2161_v33 = vsel %vm313_vm2, %v2157_v32, 0.0  ;;  %v2156_v34 = vmul.f32 %v2154_v20, %v2154_v20 }
 0xdc5   :  { %2162 = vadd.xlane.f32.xlu0 %v2161_v33 }
 0xdc6   :  { %v2158_v35 = vsel %vm313_vm2, %v2156_v34, 0.0 }
 0xdc7   :  { %2159 = vadd.xlane.f32.xlu1 %v2158_v35 }
 0xe4e   :  { %v2163_v36 = vpop.xlane.xlu0 %2162 }
 0xe4f   :  { %v2165_v37 = vmul.f32 0.03125, %v2163_v36 }
 0xe50   :  { %v2160_v38 = vpop.xlane.xlu1 %2159 }
 0xe51   :  { %v2167_v41 = vadd.f32 1e-05, %v2165_v37  ;;  %v2164_v42 = vmul.f32 0.03125, %v2160_v38 }
 0xe53   :  { %2996 = vrsqrt.f32 %v2167_v41  ;;  %v2166_v43 = vadd.f32 1e-05, %v2164_v42 }
 0xe55   :  { %2998 = vrsqrt.f32 %v2166_v43 }
 0xe60   :  { %v2997_v44 = vpop.eup %2996 }
 0xe61   :  { %v2171_v45 = vmul.f32 %v2997_v44, %v2155_v31 }
 0xe62   :  { %v2999_v46 = vpop.eup %2998 }
 0xe63   :  { %v2179_v49 = vmul.f32 %v2527_v48, %v2171_v45  ;;  %v2170_v50 = vmul.f32 %v2999_v46, %v2154_v20 }
 0xe65   :  { %v2187_v51 = vadd.f32 %v2528_v47, %v2179_v49  ;;  %v2178_v52 = vmul.f32 %v2527_v48, %v2170_v50 }
 0xe67   :  { %v2193_v53 = vsel %vm313_vm2, %v2187_v51, 0.0  ;;  %v2186_v54 = vadd.f32 %v2528_v47, %v2178_v52 }
 0xe68   :  { %2194 = vadd.xlane.f32.xlu0 %v2193_v53 }
 0xe69   :  { %v2190_v55 = vsel %vm313_vm2, %v2186_v54, 0.0 }
 0xe6a   :  { %2191 = vadd.xlane.f32.xlu1 %v2190_v55 }
 0xef1   :  { %v2195_v56 = vpop.xlane.xlu0 %2194 }
 0xef2   :  { %v2197_v57 = vmul.f32 0.03125, %v2195_v56 }
 0xef3   :  { %v2192_v58 = vpop.xlane.xlu1 %2191 }
 0xef4   :  { %v2199_v59 = vsub.f32 %v2187_v51, %v2197_v57  ;;  %v2196_v60 = vmul.f32 0.03125, %v2192_v58 }
 0xef6   :  { %v2198_v61 = vsub.f32 %v2186_v54, %v2196_v60  ;;  %v2201_v62 = vmul.f32 %v2199_v59, %v2199_v59 }
 0xef8   :  { %v2205_v63 = vsel %vm313_vm2, %v2201_v62, 0.0  ;;  %v2200_v0 = vmul.f32 %v2198_v61, %v2198_v61 }
 0xef9   :  { %2206 = vadd.xlane.f32.xlu0 %v2205_v63 }
 0xefa   :  { %v2202_v1 = vsel %vm313_vm2, %v2200_v0, 0.0 }
 0xefb   :  { %2203 = vadd.xlane.f32.xlu1 %v2202_v1 }
 0xf82   :  { %v2207_v8 = vpop.xlane.xlu0 %2206 }
 0xf83   :  { %v2209_v9 = vmul.f32 0.03125, %v2207_v8 }
 0xf84   :  { %v2204_v10 = vpop.xlane.xlu1 %2203 }
 0xf85   :  { %v2211_v11 = vadd.f32 1e-05, %v2209_v9  ;;  %v2208_v12 = vmul.f32 0.03125, %v2204_v10 }
 0xf87   :  { %3000 = vrsqrt.f32 %v2211_v11  ;;  %v2210_v13 = vadd.f32 1e-05, %v2208_v12 }
 0xf89   :  { %3002 = vrsqrt.f32 %v2210_v13 }
 0xf94   :  { %v3001_v14 = vpop.eup %3000 }
 0xf95   :  { %v2215_v16 = vmul.f32 %v3001_v14, %v2199_v59 }
 0xf96   :  { %v3003_v17 = vpop.eup %3002 }
 0xf97   :  { %v2214_v19 = vmul.f32 %v3003_v17, %v2198_v61  ;;  %v2223_v21 = vmul.f32 %v2529_v15, %v2215_v16 }
 0xf99   :  { %v2222_v23 = vmul.f32 %v2529_v15, %v2214_v19  ;;  %v2231_v25 = vadd.f32 %v2530_v22, %v2223_v21 }
 0xf9b   :  { %v2230_v24 = vadd.f32 %v2530_v22, %v2222_v23 }
 0xf9d   :  { %2951 = vmatprep.mubr.msk.f32.mxu1 %vm313_vm2, %v2230_v24 }
 0xf9e   :  { %2952 = vmatmul.mubr.msk.f32.vlgmr.msra.gmra.mxu1 %vm313_vm2, %v2231_v25 }
0x105e   :  { %v2953_v26 = vpop.f32.mrf.mxu1 }
0x105f   :  { %2346 = vst.msk [vmem:[#allocation2 + $0x8] sm:$0xff] %vm216_vm4, %v2953_v26 }
0x1060   :  { %v2336_v27 = vpop.f32.mrf.mxu1 }
0x1061   :  { %2345 = vst.msk [vmem:[#allocation2] sm:$0xff] %vm216_vm4, %v2336_v27 }
0x1062   :  { %3015 = shalt.err (!%p3012_p4)
}
0x1063   :  { %s3029_s21 = smov 128   ;;  %s3030_s0 = smov 8  }
0x1064   :  { %2358 = dma.vmem_to_hbm [thread:$0]  %s2353_s11, 256, %s3795_s23, [#allocation3], %s3029_s21, %s3029_s21, %s3030_s0  }
0x1065   :  { %3024 = dma.done.wait [#allocation3], 256  }
0x1066   :  { %3025 = vsyncadd [#allocation3], 4294967040 }
0x1067   :  { %2362 = vsyncpa [#allocation3], 1 }

</bundles_post_ra>
